<compile_context>
chip_gen: v5e
topology: v5e:2x2
jax: 0.10.0
libtpu: 0.0.40
codegen_flags: <defaults>
</compile_context>

<pallas_src>
import functools

import jax
import jax.numpy as jnp
from jax.experimental import pallas as pl
from jax.experimental.pallas import tpu as pltpu

LANE = 128  # TPU lane width: pad N (=Cout) to this so output stores are lane-dense.


def _round_up(x, m):
    return ((x + m - 1) // m) * m


def _gemm_bias_relu_kernel(x_ref, w_ref, b_ref, o_ref):
    # bf16 x bf16 on the MXU, f32 accumulate; bias + ReLU epilogue in f32.
    acc = jnp.dot(x_ref[...], w_ref[...], preferred_element_type=jnp.float32)
    acc = acc + b_ref[...]
    o_ref[...] = jnp.maximum(acc, 0.0)


def gemm_bias_relu(patches, w_t, bias, *, tile_m=512):
    """Fused (M,K)@(K,Npad) + bias + ReLU.

    patches: (M, K) f32 (cast to bf16 here)
    w_t    : (K, Npad) bf16, Npad a multiple of 128
    bias   : (1, Npad) f32
    Returns (M, Npad) f32.
    """
    M, K = patches.shape
    Kw, n_pad = w_t.shape
    assert Kw == K and n_pad % LANE == 0

    # Tile over M: multiple of 128, no larger than the (padded) problem.
    tm = min(tile_m, _round_up(M, LANE))
    m_pad = _round_up(M, tm)
    if m_pad != M:
        patches = jnp.pad(patches, ((0, m_pad - M), (0, 0)))
    x_bf16 = patches.astype(jnp.bfloat16)

    # Scoped-VMEM budget: double-buffered in/out tiles + resident weight/bias,
    # with headroom; capped at v7x physical VMEM (64 MiB).
    vmem_need = (2 * tm * K * 2        # bf16 patch tiles (double-buffered)
                 + 2 * K * n_pad * 2   # bf16 weight
                 + 2 * n_pad * 4       # bias
                 + 2 * tm * n_pad * 4)  # f32 output tiles (double-buffered)
    vmem_limit = int(min(max(4 * vmem_need, 32 * 2**20), 64 * 2**20))

    out = pl.pallas_call(
        _gemm_bias_relu_kernel,
        out_shape=jax.ShapeDtypeStruct((m_pad, n_pad), jnp.float32),
        grid=(m_pad // tm,),
        in_specs=[
            pl.BlockSpec((tm, K), lambda i: (i, 0)),
            pl.BlockSpec((K, n_pad), lambda i: (0, 0)),
            pl.BlockSpec((1, n_pad), lambda i: (0, 0)),
        ],
        out_specs=pl.BlockSpec((tm, n_pad), lambda i: (i, 0)),
        compiler_params=pltpu.CompilerParams(
            dimension_semantics=("parallel",),
            vmem_limit_bytes=vmem_limit),
    )(x_bf16, w_t, bias)
    return out[:M]


def im2col_nhwc(x, k, s):
    """x: (B, H, W, C) -> (B*Ho*Wo, k*k*C); column order = (kh, kw, cin).
    NHWC means no transposes are needed here (only strided slices)."""
    B, H, W, C = x.shape
    Ho = (H - k) // s + 1
    Wo = (W - k) // s + 1
    cols = []
    for i in range(k):
        for j in range(k):
            cols.append(x[:, i:i + s * Ho:s, j:j + s * Wo:s, :])  # (B,Ho,Wo,C)
    p = jnp.stack(cols, axis=3)                    # (B, Ho, Wo, k*k, C)
    return p.reshape(B * Ho * Wo, k * k * C), Ho, Wo


def prepare_params(params):
    """One-time prep of PyTorch-layout params (OIHW weight, bias) into the
    GEMM layout the kernel expects:
      w_t : (K, Npad) bf16, K = kh*kw*Cin (matches NHWC im2col column order)
      b   : (1, Npad) f32
    Npad = Cout rounded up to 128 for lane-dense output stores."""
    prepped = []
    for w, b in params:
        cout, cin, kh, kw = w.shape
        n_pad = _round_up(cout, LANE)
        w_t = w.transpose(2, 3, 1, 0).reshape(kh * kw * cin, cout)
        w_t = jnp.pad(w_t, ((0, 0), (0, n_pad - cout))).astype(jnp.bfloat16)
        b_p = jnp.pad(b, (0, n_pad - cout)).reshape(1, n_pad).astype(jnp.float32)
        prepped.append((w_t, b_p))
    return tuple(prepped)


def make_forward(params, strides=(4, 2, 1)):
    """Build a jitted forward pass.  Static metadata (Cout, kernel size,
    stride) is captured in the closure; only arrays flow through jit."""
    meta = tuple((int(w.shape[0]), int(w.shape[2]), s)
                 for (w, _), s in zip(params, strides))
    prepped = prepare_params(params)

    @jax.jit
    def forward(x_nchw, prepped_arrays):
        h = jnp.transpose(x_nchw, (0, 2, 3, 1))          # NCHW -> NHWC once
        for (w_t, b_p), (cout, k, s) in zip(prepped_arrays, meta):
            B = h.shape[0]
            patches, Ho, Wo = im2col_nhwc(h, k, s)
            out = gemm_bias_relu(patches, w_t, b_p)      # (M, Npad) f32
            h = out[:, :cout].reshape(B, Ho, Wo, cout)   # stay NHWC
        # Single transpose before flatten to preserve PyTorch (NCHW) order.
        h = jnp.transpose(h, (0, 3, 1, 2))
        return h.reshape(h.shape[0], -1)

    return lambda x: forward(x, prepped)


def init_params(key, in_channels=3):
    """Deterministic PyTorch-style kaiming-uniform-ish init (synthetic)."""
    def conv_init(k_, cout, cin, ksz):
        kw, kb = jax.random.split(k_)
        fan_in = cin * ksz * ksz
        bound = 1.0 / jnp.sqrt(fan_in)
        w = jax.random.uniform(kw, (cout, cin, ksz, ksz), jnp.float32, -bound, bound)
        b = jax.random.uniform(kb, (cout,), jnp.float32, -bound, bound)
        return w, b
    k1, k2, k3 = jax.random.split(key, 3)
    return (conv_init(k1, 32, in_channels, 8),
            conv_init(k2, 64, 32, 4),
            conv_init(k3, 64, 64, 3))


def ref_forward(x, params, strides=(4, 2, 1)):
    """Pure-JAX reference with matching bf16 operands / f32 accumulation."""
    h = x
    for (w, b), s in zip(params, strides):
        h = jax.lax.conv_general_dilated(
            h.astype(jnp.bfloat16), w.astype(jnp.bfloat16),
            window_strides=(s, s), padding="VALID",
            dimension_numbers=("NCHW", "OIHW", "NCHW"),
            preferred_element_type=jnp.float32)
        h = jnp.maximum(h + b.reshape(1, -1, 1, 1), 0.0)
    return h.reshape(h.shape[0], -1)


if __name__ == "__main__":
    key = jax.random.PRNGKey(0)
    kx, kp = jax.random.split(key)

    # Small but conv-stack-compatible input: 44x44 -> 10x10 -> 4x4 -> 2x2
    B, C, H, W = 2, 3, 44, 44
    x = jax.random.normal(kx, (B, C, H, W), jnp.float32)
    params = init_params(kp, in_channels=C)

    forward = make_forward(params)
    out = jax.block_until_ready(forward(x))
    assert out.shape == (B, 64 * 2 * 2), out.shape

    ref = jax.block_until_ready(ref_forward(x, params))
    # bf16 operands -> relaxed tolerance vs the previous f32 check.
    assert jnp.allclose(out, ref, atol=2e-2, rtol=2e-2), (
        "mismatch vs reference, max abs err = "
        + str(float(jnp.max(jnp.abs(out - ref)))))

    print("KERNEL_OK")
</pallas_src>

<mosaic_0001>
module attributes {stable_mosaic.version = 11 : i64} {
  func.func @_gemm_bias_relu_kernel(%arg0: i32, %arg1: memref<256x192xbf16, #tpu.memory_space<vmem>>, %arg2: memref<192x128xbf16, #tpu.memory_space<vmem>>, %arg3: memref<1x128xf32, #tpu.memory_space<vmem>>, %arg4: memref<256x128xf32, #tpu.memory_space<vmem>>) attributes {dimension_semantics = [#tpu.dimension_semantics<parallel>], iteration_bounds = array<i64: 1>, scalar_prefetch = 0 : i64, scratch_operands = 0 : i64, tpu.core_type = #tpu.core_type<tc>, window_params = [{transform_indices = @transform_0, window_bounds = array<i64: 256, 192>}, {pipeline_mode = #tpu.pipeline_mode<synchronous>, transform_indices = @transform_1, window_bounds = array<i64: 192, 128>}, {pipeline_mode = #tpu.pipeline_mode<synchronous>, transform_indices = @transform_2, window_bounds = array<i64: 1, 128>}, {transform_indices = @transform_3, window_bounds = array<i64: 256, 128>}]} {
    %c0 = arith.constant 0 : index
    %c0_0 = arith.constant 0 : index
    %0 = vector.load %arg1[%c0, %c0_0] : memref<256x192xbf16, #tpu.memory_space<vmem>>, vector<256x192xbf16>
    %c0_1 = arith.constant 0 : index
    %c0_2 = arith.constant 0 : index
    %1 = vector.load %arg2[%c0_1, %c0_2] : memref<192x128xbf16, #tpu.memory_space<vmem>>, vector<192x128xbf16>
    %cst = arith.constant dense<0.000000e+00> : vector<256x128xf32>
    %2 = tpu.matmul %0, %1, %cst {dimension_numbers = #tpu.dot_dimension_numbers<[1], [0], [0], [1], [0, 0, 1, 1], [], []>} : vector<256x192xbf16>, vector<192x128xbf16>, vector<256x128xf32> -> vector<256x128xf32>
    %c0_3 = arith.constant 0 : index
    %c0_4 = arith.constant 0 : index
    %3 = vector.load %arg3[%c0_3, %c0_4] : memref<1x128xf32, #tpu.memory_space<vmem>>, vector<1x128xf32>
    %4 = vector.broadcast %3 : vector<1x128xf32> to vector<256x128xf32>
    %5 = arith.addf %2, %4 : vector<256x128xf32>
    %cst_5 = arith.constant 0.000000e+00 : f32
    %6 = vector.broadcast %cst_5 : f32 to vector<256x128xf32>
    %7 = arith.maximumf %5, %6 : vector<256x128xf32>
    %c0_6 = arith.constant 0 : index
    %c0_7 = arith.constant 0 : index
    %8 = vector.load %arg4[%c0_6, %c0_7] : memref<256x128xf32, #tpu.memory_space<vmem>>, vector<256x128xf32>
    tpu.vector_store %arg4[%c0_6, %c0_7], %7 {strides = array<i32>} : memref<256x128xf32, #tpu.memory_space<vmem>>, vector<256x128xf32>,
    return
  }
  func.func @transform_0(%arg0: i32) -> (i32, i32) {
    %c0_i32 = arith.constant 0 : i32
    %c0_i32_0 = arith.constant 0 : i32
    return %arg0, %c0_i32 : i32, i32
  }
  func.func @transform_1(%arg0: i32) -> (i32, i32) {
    %c0_i32 = arith.constant 0 : i32
    %c0_i32_0 = arith.constant 0 : i32
    %c0_i32_1 = arith.constant 0 : i32
    return %c0_i32, %c0_i32_0 : i32, i32
  }
  func.func @transform_2(%arg0: i32) -> (i32, i32) {
    %c0_i32 = arith.constant 0 : i32
    %c0_i32_0 = arith.constant 0 : i32
    %c0_i32_1 = arith.constant 0 : i32
    return %c0_i32, %c0_i32_0 : i32, i32
  }
  func.func @transform_3(%arg0: i32) -> (i32, i32) {
    %c0_i32 = arith.constant 0 : i32
    %c0_i32_0 = arith.constant 0 : i32
    return %arg0, %c0_i32 : i32, i32
  }
}

module attributes {stable_mosaic.version = 11 : i64} {
  func.func @_gemm_bias_relu_kernel(%arg0: i32, %arg1: memref<128x512xbf16, #tpu.memory_space<vmem>>, %arg2: memref<512x128xbf16, #tpu.memory_space<vmem>>, %arg3: memref<1x128xf32, #tpu.memory_space<vmem>>, %arg4: memref<128x128xf32, #tpu.memory_space<vmem>>) attributes {dimension_semantics = [#tpu.dimension_semantics<parallel>], iteration_bounds = array<i64: 1>, scalar_prefetch = 0 : i64, scratch_operands = 0 : i64, tpu.core_type = #tpu.core_type<tc>, window_params = [{transform_indices = @transform_0, window_bounds = array<i64: 128, 512>}, {pipeline_mode = #tpu.pipeline_mode<synchronous>, transform_indices = @transform_1, window_bounds = array<i64: 512, 128>}, {pipeline_mode = #tpu.pipeline_mode<synchronous>, transform_indices = @transform_2, window_bounds = array<i64: 1, 128>}, {transform_indices = @transform_3, window_bounds = array<i64: 128, 128>}]} {
    %c0 = arith.constant 0 : index
    %c0_0 = arith.constant 0 : index
    %0 = vector.load %arg1[%c0, %c0_0] : memref<128x512xbf16, #tpu.memory_space<vmem>>, vector<128x512xbf16>
    %c0_1 = arith.constant 0 : index
    %c0_2 = arith.constant 0 : index
    %1 = vector.load %arg2[%c0_1, %c0_2] : memref<512x128xbf16, #tpu.memory_space<vmem>>, vector<512x128xbf16>
    %cst = arith.constant dense<0.000000e+00> : vector<128x128xf32>
    %2 = tpu.matmul %0, %1, %cst {dimension_numbers = #tpu.dot_dimension_numbers<[1], [0], [0], [1], [0, 0, 1, 1], [], []>} : vector<128x512xbf16>, vector<512x128xbf16>, vector<128x128xf32> -> vector<128x128xf32>
    %c0_3 = arith.constant 0 : index
    %c0_4 = arith.constant 0 : index
    %3 = vector.load %arg3[%c0_3, %c0_4] : memref<1x128xf32, #tpu.memory_space<vmem>>, vector<1x128xf32>
    %4 = vector.broadcast %3 : vector<1x128xf32> to vector<128x128xf32>
    %5 = arith.addf %2, %4 : vector<128x128xf32>
    %cst_5 = arith.constant 0.000000e+00 : f32
    %6 = vector.broadcast %cst_5 : f32 to vector<128x128xf32>
    %7 = arith.maximumf %5, %6 : vector<128x128xf32>
    %c0_6 = arith.constant 0 : index
    %c0_7 = arith.constant 0 : index
    %8 = vector.load %arg4[%c0_6, %c0_7] : memref<128x128xf32, #tpu.memory_space<vmem>>, vector<128x128xf32>
    tpu.vector_store %arg4[%c0_6, %c0_7], %7 {strides = array<i32>} : memref<128x128xf32, #tpu.memory_space<vmem>>, vector<128x128xf32>,
    return
  }
  func.func @transform_0(%arg0: i32) -> (i32, i32) {
    %c0_i32 = arith.constant 0 : i32
    %c0_i32_0 = arith.constant 0 : i32
    return %arg0, %c0_i32 : i32, i32
  }
  func.func @transform_1(%arg0: i32) -> (i32, i32) {
    %c0_i32 = arith.constant 0 : i32
    %c0_i32_0 = arith.constant 0 : i32
    %c0_i32_1 = arith.constant 0 : i32
    return %c0_i32, %c0_i32_0 : i32, i32
  }
  func.func @transform_2(%arg0: i32) -> (i32, i32) {
    %c0_i32 = arith.constant 0 : i32
    %c0_i32_0 = arith.constant 0 : i32
    %c0_i32_1 = arith.constant 0 : i32
    return %c0_i32, %c0_i32_0 : i32, i32
  }
  func.func @transform_3(%arg0: i32) -> (i32, i32) {
    %c0_i32 = arith.constant 0 : i32
    %c0_i32_0 = arith.constant 0 : i32
    return %arg0, %c0_i32 : i32, i32
  }
}

module attributes {stable_mosaic.version = 11 : i64} {
  func.func @_gemm_bias_relu_kernel(%arg0: i32, %arg1: memref<128x576xbf16, #tpu.memory_space<vmem>>, %arg2: memref<576x128xbf16, #tpu.memory_space<vmem>>, %arg3: memref<1x128xf32, #tpu.memory_space<vmem>>, %arg4: memref<128x128xf32, #tpu.memory_space<vmem>>) attributes {dimension_semantics = [#tpu.dimension_semantics<parallel>], iteration_bounds = array<i64: 1>, scalar_prefetch = 0 : i64, scratch_operands = 0 : i64, tpu.core_type = #tpu.core_type<tc>, window_params = [{transform_indices = @transform_0, window_bounds = array<i64: 128, 576>}, {pipeline_mode = #tpu.pipeline_mode<synchronous>, transform_indices = @transform_1, window_bounds = array<i64: 576, 128>}, {pipeline_mode = #tpu.pipeline_mode<synchronous>, transform_indices = @transform_2, window_bounds = array<i64: 1, 128>}, {transform_indices = @transform_3, window_bounds = array<i64: 128, 128>}]} {
    %c0 = arith.constant 0 : index
    %c0_0 = arith.constant 0 : index
    %0 = vector.load %arg1[%c0, %c0_0] : memref<128x576xbf16, #tpu.memory_space<vmem>>, vector<128x576xbf16>
    %c0_1 = arith.constant 0 : index
    %c0_2 = arith.constant 0 : index
    %1 = vector.load %arg2[%c0_1, %c0_2] : memref<576x128xbf16, #tpu.memory_space<vmem>>, vector<576x128xbf16>
    %cst = arith.constant dense<0.000000e+00> : vector<128x128xf32>
    %2 = tpu.matmul %0, %1, %cst {dimension_numbers = #tpu.dot_dimension_numbers<[1], [0], [0], [1], [0, 0, 1, 1], [], []>} : vector<128x576xbf16>, vector<576x128xbf16>, vector<128x128xf32> -> vector<128x128xf32>
    %c0_3 = arith.constant 0 : index
    %c0_4 = arith.constant 0 : index
    %3 = vector.load %arg3[%c0_3, %c0_4] : memref<1x128xf32, #tpu.memory_space<vmem>>, vector<1x128xf32>
    %4 = vector.broadcast %3 : vector<1x128xf32> to vector<128x128xf32>
    %5 = arith.addf %2, %4 : vector<128x128xf32>
    %cst_5 = arith.constant 0.000000e+00 : f32
    %6 = vector.broadcast %cst_5 : f32 to vector<128x128xf32>
    %7 = arith.maximumf %5, %6 : vector<128x128xf32>
    %c0_6 = arith.constant 0 : index
    %c0_7 = arith.constant 0 : index
    %8 = vector.load %arg4[%c0_6, %c0_7] : memref<128x128xf32, #tpu.memory_space<vmem>>, vector<128x128xf32>
    tpu.vector_store %arg4[%c0_6, %c0_7], %7 {strides = array<i32>} : memref<128x128xf32, #tpu.memory_space<vmem>>, vector<128x128xf32>,
    return
  }
  func.func @transform_0(%arg0: i32) -> (i32, i32) {
    %c0_i32 = arith.constant 0 : i32
    %c0_i32_0 = arith.constant 0 : i32
    return %arg0, %c0_i32 : i32, i32
  }
  func.func @transform_1(%arg0: i32) -> (i32, i32) {
    %c0_i32 = arith.constant 0 : i32
    %c0_i32_0 = arith.constant 0 : i32
    %c0_i32_1 = arith.constant 0 : i32
    return %c0_i32, %c0_i32_0 : i32, i32
  }
  func.func @transform_2(%arg0: i32) -> (i32, i32) {
    %c0_i32 = arith.constant 0 : i32
    %c0_i32_0 = arith.constant 0 : i32
    %c0_i32_1 = arith.constant 0 : i32
    return %c0_i32, %c0_i32_0 : i32, i32
  }
  func.func @transform_3(%arg0: i32) -> (i32, i32) {
    %c0_i32 = arith.constant 0 : i32
    %c0_i32_0 = arith.constant 0 : i32
    return %arg0, %c0_i32 : i32, i32
  }
}

</mosaic_0001>

<bundles_post_ra>
// kernel: forward.3
= control target key start
LH: loop header
LB: loop body
LE: loop exit
PB: predicated region body
PF: predicated region fallthrough
CT: control target
= control target key end

     0   :  { %vm291_vm0 = vcmask 523264   ;;  %s1238_s1 = inlined_call_operand.vmem [shape: bf16[192,128], index: 1, kind: input, shape index: {}]   ;;  %s1239_s0 = inlined_call_operand.vmem [shape: bf16[256,192], index: 0, kind: input, shape index: {}]   ;;  %s1240_s2 = inlined_call_operand.vmem [shape: f32[1,128], index: 2, kind: input, shape index: {}]   ;;  %s1241_s3 = inlined_call_operand.vmem [shape: f32[256,128], index: 3, kind: output, shape index: {}]  }
   0x1   :  { %v817_v0 = vld [vmem:[%s1238_s1 + $0x38] sm:$0xff]  ;;  %v816_v2 = vld [vmem:[%s1238_s1 + $0x30] sm:$0xff]  ;;  %v815_v4 = vld [vmem:[%s1238_s1 + $0x28] sm:$0xff] }
   0x2   :  { %v821_v1 = vld [vmem:[%s1238_s1 + $0x58] sm:$0xff]  ;;  %340 = vmatpush.bf16.msra.mxu0 %v817_v0  ;;  %822 = vmatpush.bf16.msra.mxu2 %v817_v0  ;;  %v820_v3 = vld [vmem:[%s1238_s1 + $0x50] sm:$0xff]  ;;  %v819_v5 = vld [vmem:[%s1238_s1 + $0x48] sm:$0xff] }
   0x3   :  { %433 = vmatpush.bf16.msra.mxu1 %v821_v1  ;;  %830 = vmatpush.bf16.msra.mxu3 %v821_v1  ;;  %v814_v6 = vld [vmem:[%s1238_s1 + $0x20] sm:$0xff]  ;;  %v590_v9 = vld [vmem:[%s1239_s0 + $0x8] sm:$0xf0]  ;;  %v796_v10 = vld [vmem:[%s1239_s0 + $0x94] sm:$0xf] }
   0x4   :  { %v818_v7 = vld [vmem:[%s1238_s1 + $0x40] sm:$0xff]  ;;  %v662_v11 = vld [vmem:[%s1239_s0 + $0x98] sm:$0xf0]  ;;  %v812_v15 = vld [vmem:[%s1238_s1 + $0x10] sm:$0xff] }
   0x5   :  { %v778_v8 = vld [vmem:[%s1239_s0 + $0x4] sm:$0xf]  ;;  %v813_v13 = vld [vmem:[%s1238_s1 + $0x18] sm:$0xff]  ;;  %v665_v14 = vor.u32 %v796_v10, %v662_v11  ;;  %v811_v16 = vld [vmem:[%s1238_s1 + $0x8] sm:$0xff] }
   0x6   :  { %341 = vmatpush.bf16.msra.mxu0 %v816_v2  ;;  %823 = vmatpush.bf16.msra.mxu2 %v816_v2  ;;  %v593_v12 = vor.u32 %v778_v8, %v590_v9  ;;  %v810_v17 = vld [vmem:[%s1238_s1] sm:$0xff]  ;;  %v779_v19 = vld [vmem:[%s1239_s0 + $0x4] sm:$0xf0]  ;;  %v780_v22 = vld [vmem:[%s1239_s0 + $0x14] sm:$0xf] }
   0x7   :  { %434 = vmatpush.bf16.msra.mxu1 %v820_v3  ;;  %831 = vmatpush.bf16.msra.mxu3 %v820_v3  ;;  %v588_v18 = vld [vmem:[%s1239_s0] sm:$0xf]  ;;  %v795_v21 = vld [vmem:[%s1239_s0 + $0x84] sm:$0xf0]  ;;  %v598_v23 = vld [vmem:[%s1239_s0 + $0x18] sm:$0xf0] }
   0x8   :  { %v652_v20 = vld [vmem:[%s1239_s0 + $0x80] sm:$0xf]  ;;  %v798_v24 = vld [vmem:[%s1239_s0 + $0xa4] sm:$0xf]  ;;  %v670_v25 = vld [vmem:[%s1239_s0 + $0xa8] sm:$0xf0]  ;;  %v589_v26 = vor.u32 %v779_v19, %v588_v18  ;;  %v601_v28 = vor.u32 %v780_v22, %v598_v23 }
   0x9   :  { %v653_v27 = vor.u32 %v795_v21, %v652_v20  ;;  %v673_v29 = vor.u32 %v798_v24, %v670_v25  ;;  %v596_v30 = vld [vmem:[%s1239_s0 + $0x10] sm:$0xf]  ;;  %v781_v31 = vld [vmem:[%s1239_s0 + $0x14] sm:$0xf0]  ;;  %v782_v34 = vld [vmem:[%s1239_s0 + $0x24] sm:$0xf] }
   0xa   :  { %342 = vmatpush.bf16.msra.mxu0 %v815_v4  ;;  %824 = vmatpush.bf16.msra.mxu2 %v815_v4  ;;  %v660_v32 = vld [vmem:[%s1239_s0 + $0x90] sm:$0xf]  ;;  %v797_v33 = vld [vmem:[%s1239_s0 + $0x94] sm:$0xf0]  ;;  %v606_v35 = vld [vmem:[%s1239_s0 + $0x28] sm:$0xf0]  ;;  %v597_v38 = vor.u32 %v781_v31, %v596_v30 }
   0xb   :  { %435 = vmatpush.bf16.msra.mxu1 %v819_v5  ;;  %832 = vmatpush.bf16.msra.mxu3 %v819_v5  ;;  %v800_v36 = vld [vmem:[%s1239_s0 + $0xb4] sm:$0xf]  ;;  %v678_v37 = vld [vmem:[%s1239_s0 + $0xb8] sm:$0xf0]  ;;  %v661_v39 = vor.u32 %v797_v33, %v660_v32  ;;  %v609_v40 = vor.u32 %v782_v34, %v606_v35  ;;  %v604_v42 = vld [vmem:[%s1239_s0 + $0x20] sm:$0xf] }
   0xc   :  { %v681_v41 = vor.u32 %v800_v36, %v678_v37  ;;  %v783_v43 = vld [vmem:[%s1239_s0 + $0x24] sm:$0xf0]  ;;  %v668_v44 = vld [vmem:[%s1239_s0 + $0xa0] sm:$0xf]  ;;  %v784_v46 = vld [vmem:[%s1239_s0 + $0x34] sm:$0xf] }
   0xd   :  { %v799_v45 = vld [vmem:[%s1239_s0 + $0xa4] sm:$0xf0]  ;;  %v614_v47 = vld [vmem:[%s1239_s0 + $0x38] sm:$0xf0]  ;;  %v802_v48 = vld [vmem:[%s1239_s0 + $0xc4] sm:$0xf]  ;;  %v605_v50 = vor.u32 %v783_v43, %v604_v42 }
   0xe   :  { %343 = vmatpush.bf16.msra.mxu0 %v814_v6  ;;  %825 = vmatpush.bf16.msra.mxu2 %v814_v6  ;;  %v686_v49 = vld [vmem:[%s1239_s0 + $0xc8] sm:$0xf0]  ;;  %v669_v51 = vor.u32 %v799_v45, %v668_v44  ;;  %v617_v52 = vor.u32 %v784_v46, %v614_v47  ;;  %v612_v54 = vld [vmem:[%s1239_s0 + $0x30] sm:$0xf]  ;;  %v785_v55 = vld [vmem:[%s1239_s0 + $0x34] sm:$0xf0] }
   0xf   :  { %436 = vmatpush.bf16.msra.mxu1 %v818_v7  ;;  %833 = vmatpush.bf16.msra.mxu3 %v818_v7  ;;  %v689_v53 = vor.u32 %v802_v48, %v686_v49  ;;  %v676_v56 = vld [vmem:[%s1239_s0 + $0xb0] sm:$0xf]  ;;  %v801_v57 = vld [vmem:[%s1239_s0 + $0xb4] sm:$0xf0]  ;;  %v786_v58 = vld [vmem:[%s1239_s0 + $0x44] sm:$0xf]  ;;  %v613_v62 = vor.u32 %v785_v55, %v612_v54 }
  0x10   :  { %v622_v59 = vld [vmem:[%s1239_s0 + $0x48] sm:$0xf0]  ;;  %v804_v60 = vld [vmem:[%s1239_s0 + $0xd4] sm:$0xf]  ;;  %v694_v61 = vld [vmem:[%s1239_s0 + $0xd8] sm:$0xf0]  ;;  %v677_v63 = vor.u32 %v801_v57, %v676_v56 }
  0x11   :  { %v625_v0 = vor.u32 %v786_v58, %v622_v59  ;;  %v697_v1 = vor.u32 %v804_v60, %v694_v61  ;;  %v620_v2 = vld [vmem:[%s1239_s0 + $0x40] sm:$0xf]  ;;  %v787_v3 = vld [vmem:[%s1239_s0 + $0x44] sm:$0xf0]  ;;  %v788_v6 = vld [vmem:[%s1239_s0 + $0x54] sm:$0xf] }
  0x12   :  { %762 = vmatmul.msk.bf16.vlgmr.msra.gmra.mxu1 %vm291_vm0, %v593_v12  ;;  %344 = vmatpush.bf16.msra.mxu0 %v813_v13  ;;  %v684_v4 = vld [vmem:[%s1239_s0 + $0xc0] sm:$0xf]  ;;  %v803_v5 = vld [vmem:[%s1239_s0 + $0xc4] sm:$0xf0]  ;;  %v630_v7 = vld [vmem:[%s1239_s0 + $0x58] sm:$0xf0]  ;;  %v621_v10 = vor.u32 %v787_v3, %v620_v2 }
  0x13   :  { %826 = vmatpush.bf16.msra.mxu2 %v813_v13  ;;  %771 = vmatmul.msk.bf16.vlgmr.msra.gmra.mxu3 %vm291_vm0, %v665_v14  ;;  %v806_v8 = vld [vmem:[%s1239_s0 + $0xe4] sm:$0xf]  ;;  %v702_v9 = vld [vmem:[%s1239_s0 + $0xe8] sm:$0xf0]  ;;  %v685_v11 = vor.u32 %v803_v5, %v684_v4  ;;  %v633_v12 = vor.u32 %v788_v6, %v630_v7  ;;  %v628_v14 = vld [vmem:[%s1239_s0 + $0x50] sm:$0xf] }
  0x14   :  { %v705_v13 = vor.u32 %v806_v8, %v702_v9  ;;  %v790_v18 = vld [vmem:[%s1239_s0 + $0x64] sm:$0xf]  ;;  %v638_v19 = vld [vmem:[%s1239_s0 + $0x68] sm:$0xf0]  ;;  %v808_v20 = vld [vmem:[%s1239_s0 + $0xf4] sm:$0xf] }
  0x15   :  { %v710_v21 = vld [vmem:[%s1239_s0 + $0xf8] sm:$0xf0]  ;;  %v641_v24 = vor.u32 %v790_v18, %v638_v19  ;;  %v792_v30 = vld [vmem:[%s1239_s0 + $0x74] sm:$0xf]  ;;  %v644_v35 = vld [vmem:[%s1239_s0 + $0x70] sm:$0xf] }
  0x16   :  { %345 = vmatpush.bf16.msra.mxu0 %v812_v15  ;;  %v713_v25 = vor.u32 %v808_v20, %v710_v21  ;;  %v646_v31 = vld [vmem:[%s1239_s0 + $0x78] sm:$0xf0]  ;;  %v793_v36 = vld [vmem:[%s1239_s0 + $0x74] sm:$0xf0]  ;;  %v708_v37 = vld [vmem:[%s1239_s0 + $0xf0] sm:$0xf] }
  0x17   :  { %827 = vmatpush.bf16.msra.mxu2 %v812_v15  ;;  %v789_v15 = vld [vmem:[%s1239_s0 + $0x54] sm:$0xf0]  ;;  %v649_v34 = vor.u32 %v792_v30, %v646_v31  ;;  %v1102_v46 = vld [vmem:[%s1240_s2] ss:$0 sm:$0xff] }
  0x18   :  { %v629_v22 = vor.u32 %v789_v15, %v628_v14 }
  0x1a   :  { %346 = vmatpush.bf16.msra.mxu0 %v811_v16 }
  0x1b   :  { %828 = vmatpush.bf16.msra.mxu2 %v811_v16  ;;  %v692_v16 = vld [vmem:[%s1239_s0 + $0xd0] sm:$0xf] }
  0x1e   :  { %347 = vmatpush.bf16.msra.mxu0 %v810_v17 }
  0x1f   :  { %829 = vmatpush.bf16.msra.mxu2 %v810_v17  ;;  %v805_v17 = vld [vmem:[%s1239_s0 + $0xd4] sm:$0xf0] }
  0x20   :  { %v693_v23 = vor.u32 %v805_v17, %v692_v16 }
  0x21   :  { %348 = vmatmul.bf16.vlgmr.msra.gmra.mxu0 %v589_v26  ;;  %v636_v26 = vld [vmem:[%s1239_s0 + $0x60] sm:$0xf] }
  0x22   :  { %388 = vmatmul.bf16.vlgmr.msra.gmra.mxu2 %v653_v27  ;;  %763 = vmatmul.msk.bf16.gmra.mxu1 %vm291_vm0, %v601_v28  ;;  %v791_v27 = vld [vmem:[%s1239_s0 + $0x64] sm:$0xf0]  ;;  %v700_v28 = vld [vmem:[%s1239_s0 + $0xe0] sm:$0xf] }
  0x23   :  { %772 = vmatmul.msk.bf16.gmra.mxu3 %vm291_vm0, %v673_v29  ;;  %v807_v29 = vld [vmem:[%s1239_s0 + $0xe4] sm:$0xf0]  ;;  %v637_v32 = vor.u32 %v791_v27, %v636_v26 }
  0x24   :  { %v701_v33 = vor.u32 %v807_v29, %v700_v28 }
  0x31   :  { %353 = vmatmul.bf16.gmra.mxu0 %v597_v38  ;;  %v809_v38 = vld [vmem:[%s1239_s0 + $0xf4] sm:$0xf0] }
  0x32   :  { %393 = vmatmul.bf16.gmra.mxu2 %v661_v39  ;;  %764 = vmatmul.msk.bf16.gmra.mxu1 %vm291_vm0, %v609_v40  ;;  %v794_v39 = vld [vmem:[%s1239_s0 + $0x84] sm:$0xf]  ;;  %v654_v40 = vld [vmem:[%s1239_s0 + $0x88] sm:$0xf0]  ;;  %v709_v42 = vor.u32 %v809_v38, %v708_v37 }
  0x33   :  { %773 = vmatmul.msk.bf16.gmra.mxu3 %vm291_vm0, %v681_v41  ;;  %v645_v41 = vor.u32 %v793_v36, %v644_v35  ;;  %v657_v43 = vor.u32 %v794_v39, %v654_v40 }
  0x41   :  { %358 = vmatmul.bf16.gmra.mxu0 %v605_v50 }
  0x42   :  { %398 = vmatmul.bf16.gmra.mxu2 %v669_v51  ;;  %765 = vmatmul.msk.bf16.gmra.mxu1 %vm291_vm0, %v617_v52 }
  0x43   :  { %774 = vmatmul.msk.bf16.gmra.mxu3 %vm291_vm0, %v689_v53 }
  0x51   :  { %363 = vmatmul.bf16.gmra.mxu0 %v613_v62 }
  0x52   :  { %403 = vmatmul.bf16.gmra.mxu2 %v677_v63  ;;  %766 = vmatmul.msk.bf16.gmra.mxu1 %vm291_vm0, %v625_v0 }
  0x53   :  { %775 = vmatmul.msk.bf16.gmra.mxu3 %vm291_vm0, %v697_v1 }
  0x61   :  { %368 = vmatmul.bf16.gmra.mxu0 %v621_v10 }
  0x62   :  { %408 = vmatmul.bf16.gmra.mxu2 %v685_v11  ;;  %767 = vmatmul.msk.bf16.gmra.mxu1 %vm291_vm0, %v633_v12 }
  0x63   :  { %776 = vmatmul.msk.bf16.gmra.mxu3 %vm291_vm0, %v705_v13 }
  0x71   :  { %373 = vmatmul.bf16.gmra.mxu0 %v629_v22 }
  0x72   :  { %413 = vmatmul.bf16.gmra.mxu2 %v693_v23  ;;  %768 = vmatmul.msk.bf16.gmra.mxu1 %vm291_vm0, %v641_v24 }
  0x73   :  { %777 = vmatmul.msk.bf16.gmra.mxu3 %vm291_vm0, %v713_v25 }
  0x81   :  { %378 = vmatmul.bf16.gmra.mxu0 %v637_v32 }
  0x82   :  { %418 = vmatmul.bf16.gmra.mxu2 %v701_v33  ;;  %769 = vmatmul.msk.bf16.gmra.mxu1 %vm291_vm0, %v649_v34 }
  0x8f   :  { %v438_v44 = vpop.f32.mrf.mxu1 }
  0x91   :  { %383 = vmatmul.bf16.gmra.mxu0 %v645_v41 }
  0x92   :  { %423 = vmatmul.bf16.gmra.mxu2 %v709_v42  ;;  %770 = vmatmul.msk.bf16.gmra.mxu1 %vm291_vm0, %v657_v43 }
  0x96   :  { %v483_v47 = vpop.f32.mrf.mxu3 }
  0x97   :  { %v440_v45 = vpop.f32.mrf.mxu1 }
  0x9e   :  { %v349_v48 = vpop.f32.mrf.mxu0  ;;  %v485_v57 = vpop.f32.mrf.mxu3 }
  0x9f   :  { %v350_v49 = vadd.f32 %v1102_v46, %v349_v48  ;;  %v443_v50 = vpop.f32.mrf.mxu1 }
  0xa1   :  { %v439_v51 = vadd.f32 %v438_v44, %v350_v49 }
  0xa3   :  { %v518_v52 = vmax.f32 %v439_v51, 0.0 }
  0xa5   :  { %550 = vst [vmem:[%s1241_s3] sm:$0xff] %v518_v52  ;;  %v1108_v53 = vpop.f32.mrf.mxu2 }
  0xa6   :  { %v351_v54 = vpop.f32.mrf.mxu0  ;;  %v488_v1 = vpop.f32.mrf.mxu3 }
  0xa7   :  { %v352_v55 = vadd.f32 %v1102_v46, %v351_v54  ;;  %v445_v56 = vpop.f32.mrf.mxu1 }
  0xa9   :  { %v441_v58 = vadd.f32 %v440_v45, %v352_v55 }
  0xab   :  { %v519_v59 = vmax.f32 %v441_v58, 0.0 }
  0xad   :  { %551 = vst [vmem:[%s1241_s3 + $0x8] sm:$0xff] %v519_v59  ;;  %v1114_v60 = vpop.f32.mrf.mxu2 }
  0xae   :  { %v354_v61 = vpop.f32.mrf.mxu0  ;;  %v490_v12 = vpop.f32.mrf.mxu3 }
  0xaf   :  { %v355_v62 = vadd.f32 %v1102_v46, %v354_v61  ;;  %v448_v63 = vpop.f32.mrf.mxu1 }
  0xb1   :  { %v444_v0 = vadd.f32 %v443_v50, %v355_v62 }
  0xb3   :  { %v520_v2 = vmax.f32 %v444_v0, 0.0 }
  0xb5   :  { %552 = vst [vmem:[%s1241_s3 + $0x10] sm:$0xff] %v520_v2  ;;  %v394_v3 = vpop.f32.mrf.mxu2 }
  0xb6   :  { %v395_v4 = vadd.f32 %v1102_v46, %v394_v3  ;;  %v356_v5 = vpop.f32.mrf.mxu0  ;;  %v493_v23 = vpop.f32.mrf.mxu3 }
  0xb7   :  { %v357_v6 = vadd.f32 %v1102_v46, %v356_v5  ;;  %v450_v7 = vpop.f32.mrf.mxu1 }
  0xb8   :  { %v484_v8 = vadd.f32 %v483_v47, %v395_v4 }
  0xb9   :  { %v446_v9 = vadd.f32 %v445_v56, %v357_v6 }
  0xba   :  { %v536_v10 = vmax.f32 %v484_v8, 0.0 }
  0xbb   :  { %v521_v11 = vmax.f32 %v446_v9, 0.0 }
  0xbc   :  { %568 = vst [vmem:[%s1241_s3 + $0x90] sm:$0xff] %v536_v10 }
  0xbd   :  { %553 = vst [vmem:[%s1241_s3 + $0x18] sm:$0xff] %v521_v11  ;;  %v396_v13 = vpop.f32.mrf.mxu2 }
  0xbe   :  { %v397_v14 = vadd.f32 %v1102_v46, %v396_v13  ;;  %v359_v15 = vpop.f32.mrf.mxu0  ;;  %v495_v37 = vpop.f32.mrf.mxu3 }
  0xbf   :  { %v360_v16 = vadd.f32 %v1102_v46, %v359_v15  ;;  %v453_v17 = vpop.f32.mrf.mxu1 }
  0xc0   :  { %v486_v18 = vadd.f32 %v485_v57, %v397_v14 }
  0xc1   :  { %v449_v19 = vadd.f32 %v448_v63, %v360_v16 }
  0xc2   :  { %v537_v20 = vmax.f32 %v486_v18, 0.0 }
  0xc3   :  { %v522_v21 = vmax.f32 %v449_v19, 0.0 }
  0xc4   :  { %569 = vst [vmem:[%s1241_s3 + $0x98] sm:$0xff] %v537_v20 }
  0xc5   :  { %554 = vst [vmem:[%s1241_s3 + $0x20] sm:$0xff] %v522_v21  ;;  %v399_v22 = vpop.f32.mrf.mxu2 }
  0xc6   :  { %v400_v24 = vadd.f32 %v1102_v46, %v399_v22  ;;  %v361_v25 = vpop.f32.mrf.mxu0  ;;  %v498_v50 = vpop.f32.mrf.mxu3 }
  0xc7   :  { %v362_v26 = vadd.f32 %v1102_v46, %v361_v25  ;;  %v455_v27 = vpop.f32.mrf.mxu1 }
  0xc8   :  { %v489_v28 = vadd.f32 %v488_v1, %v400_v24 }
  0xc9   :  { %v451_v29 = vadd.f32 %v450_v7, %v362_v26 }
  0xca   :  { %v538_v30 = vmax.f32 %v489_v28, 0.0 }
  0xcb   :  { %v523_v31 = vmax.f32 %v451_v29, 0.0 }
  0xcc   :  { %570 = vst [vmem:[%s1241_s3 + $0xa0] sm:$0xff] %v538_v30 }
  0xcd   :  { %555 = vst [vmem:[%s1241_s3 + $0x28] sm:$0xff] %v523_v31  ;;  %v401_v32 = vpop.f32.mrf.mxu2 }
  0xce   :  { %v402_v33 = vadd.f32 %v1102_v46, %v401_v32  ;;  %v364_v34 = vpop.f32.mrf.mxu0  ;;  %v500_v0 = vpop.f32.mrf.mxu3 }
  0xcf   :  { %v365_v35 = vadd.f32 %v1102_v46, %v364_v34  ;;  %v458_v36 = vpop.f32.mrf.mxu1 }
  0xd0   :  { %v491_v38 = vadd.f32 %v490_v12, %v402_v33 }
  0xd1   :  { %v454_v39 = vadd.f32 %v453_v17, %v365_v35 }
  0xd2   :  { %v539_v40 = vmax.f32 %v491_v38, 0.0 }
  0xd3   :  { %v524_v41 = vmax.f32 %v454_v39, 0.0 }
  0xd4   :  { %571 = vst [vmem:[%s1241_s3 + $0xa8] sm:$0xff] %v539_v40 }
  0xd5   :  { %556 = vst [vmem:[%s1241_s3 + $0x30] sm:$0xff] %v524_v41  ;;  %v404_v42 = vpop.f32.mrf.mxu2 }
  0xd6   :  { %v405_v43 = vadd.f32 %v1102_v46, %v404_v42  ;;  %v366_v44 = vpop.f32.mrf.mxu0  ;;  %v503_v11 = vpop.f32.mrf.mxu3 }
  0xd7   :  { %v367_v45 = vadd.f32 %v1102_v46, %v366_v44  ;;  %v460_v47 = vpop.f32.mrf.mxu1 }
  0xd8   :  { %v494_v48 = vadd.f32 %v493_v23, %v405_v43 }
  0xd9   :  { %v456_v49 = vadd.f32 %v455_v27, %v367_v45 }
  0xda   :  { %v540_v51 = vmax.f32 %v494_v48, 0.0 }
  0xdb   :  { %v525_v52 = vmax.f32 %v456_v49, 0.0 }
  0xdc   :  { %572 = vst [vmem:[%s1241_s3 + $0xb0] sm:$0xff] %v540_v51 }
  0xdd   :  { %557 = vst [vmem:[%s1241_s3 + $0x38] sm:$0xff] %v525_v52  ;;  %v406_v54 = vpop.f32.mrf.mxu2  ;;  %v390_v52 = vadd.f32 %v1102_v46, %v1108_v53 }
  0xde   :  { %v407_v55 = vadd.f32 %v1102_v46, %v406_v54  ;;  %v369_v56 = vpop.f32.mrf.mxu0  ;;  %v505_v25 = vpop.f32.mrf.mxu3 }
  0xdf   :  { %v370_v57 = vadd.f32 %v1102_v46, %v369_v56  ;;  %v463_v58 = vpop.f32.mrf.mxu1 }
  0xe0   :  { %v496_v59 = vadd.f32 %v495_v37, %v407_v55 }
  0xe1   :  { %v459_v61 = vadd.f32 %v458_v36, %v370_v57 }
  0xe2   :  { %v541_v62 = vmax.f32 %v496_v59, 0.0 }
  0xe3   :  { %v526_v63 = vmax.f32 %v459_v61, 0.0 }
  0xe4   :  { %573 = vst [vmem:[%s1241_s3 + $0xb8] sm:$0xff] %v541_v62 }
  0xe5   :  { %558 = vst [vmem:[%s1241_s3 + $0x40] sm:$0xff] %v526_v63  ;;  %v409_v1 = vpop.f32.mrf.mxu2 }
  0xe6   :  { %v410_v2 = vadd.f32 %v1102_v46, %v409_v1  ;;  %v371_v3 = vpop.f32.mrf.mxu0  ;;  %v508_v37 = vpop.f32.mrf.mxu3 }
  0xe7   :  { %v372_v4 = vadd.f32 %v1102_v46, %v371_v3  ;;  %v465_v5 = vpop.f32.mrf.mxu1 }
  0xe8   :  { %v499_v6 = vadd.f32 %v498_v50, %v410_v2  ;;  %v392_v2 = vadd.f32 %v1102_v46, %v1114_v60 }
  0xe9   :  { %v461_v7 = vadd.f32 %v460_v47, %v372_v4 }
  0xea   :  { %v542_v8 = vmax.f32 %v499_v6, 0.0 }
  0xeb   :  { %v527_v9 = vmax.f32 %v461_v7, 0.0 }
  0xec   :  { %574 = vst [vmem:[%s1241_s3 + $0xc0] sm:$0xff] %v542_v8 }
  0xed   :  { %559 = vst [vmem:[%s1241_s3 + $0x48] sm:$0xff] %v527_v9  ;;  %v411_v10 = vpop.f32.mrf.mxu2 }
  0xee   :  { %v412_v12 = vadd.f32 %v1102_v46, %v411_v10  ;;  %v374_v13 = vpop.f32.mrf.mxu0  ;;  %v510_v50 = vpop.f32.mrf.mxu3 }
  0xef   :  { %v375_v14 = vadd.f32 %v1102_v46, %v374_v13  ;;  %v468_v15 = vpop.f32.mrf.mxu1 }
  0xf0   :  { %v501_v16 = vadd.f32 %v500_v0, %v412_v12 }
  0xf1   :  { %v464_v17 = vadd.f32 %v463_v58, %v375_v14 }
  0xf2   :  { %v543_v18 = vmax.f32 %v501_v16, 0.0 }
  0xf3   :  { %v528_v19 = vmax.f32 %v464_v17, 0.0 }
  0xf4   :  { %575 = vst [vmem:[%s1241_s3 + $0xc8] sm:$0xff] %v543_v18 }
  0xf5   :  { %560 = vst [vmem:[%s1241_s3 + $0x50] sm:$0xff] %v528_v19  ;;  %v414_v20 = vpop.f32.mrf.mxu2 }
  0xf6   :  { %v415_v21 = vadd.f32 %v1102_v46, %v414_v20  ;;  %v376_v22 = vpop.f32.mrf.mxu0  ;;  %v513_v53 = vpop.f32.mrf.mxu3 }
  0xf7   :  { %v377_v23 = vadd.f32 %v1102_v46, %v376_v22  ;;  %v470_v24 = vpop.f32.mrf.mxu1 }
  0xf8   :  { %v504_v26 = vadd.f32 %v503_v11, %v415_v21 }
  0xf9   :  { %v466_v27 = vadd.f32 %v465_v5, %v377_v23 }
  0xfa   :  { %v544_v28 = vmax.f32 %v504_v26, 0.0 }
  0xfb   :  { %v529_v29 = vmax.f32 %v466_v27, 0.0 }
  0xfc   :  { %576 = vst [vmem:[%s1241_s3 + $0xd0] sm:$0xff] %v544_v28 }
  0xfd   :  { %561 = vst [vmem:[%s1241_s3 + $0x58] sm:$0xff] %v529_v29  ;;  %v416_v30 = vpop.f32.mrf.mxu2 }
  0xfe   :  { %v417_v31 = vadd.f32 %v1102_v46, %v416_v30  ;;  %v379_v32 = vpop.f32.mrf.mxu0  ;;  %v515_v14 = vpop.f32.mrf.mxu3 }
  0xff   :  { %v380_v33 = vadd.f32 %v1102_v46, %v379_v32  ;;  %v473_v34 = vpop.f32.mrf.mxu1 }
 0x100   :  { %v506_v35 = vadd.f32 %v505_v25, %v417_v31 }
 0x101   :  { %v469_v36 = vadd.f32 %v468_v15, %v380_v33 }
 0x102   :  { %v545_v38 = vmax.f32 %v506_v35, 0.0 }
 0x103   :  { %v530_v39 = vmax.f32 %v469_v36, 0.0 }
 0x104   :  { %577 = vst [vmem:[%s1241_s3 + $0xd8] sm:$0xff] %v545_v38 }
 0x105   :  { %562 = vst [vmem:[%s1241_s3 + $0x60] sm:$0xff] %v530_v39  ;;  %v419_v40 = vpop.f32.mrf.mxu2 }
 0x106   :  { %v420_v41 = vadd.f32 %v1102_v46, %v419_v40  ;;  %v381_v42 = vpop.f32.mrf.mxu0 }
 0x107   :  { %v382_v43 = vadd.f32 %v1102_v46, %v381_v42  ;;  %v475_v44 = vpop.f32.mrf.mxu1 }
 0x108   :  { %v509_v45 = vadd.f32 %v508_v37, %v420_v41 }
 0x109   :  { %v471_v47 = vadd.f32 %v470_v24, %v382_v43 }
 0x10a   :  { %v546_v48 = vmax.f32 %v509_v45, 0.0 }
 0x10b   :  { %v531_v49 = vmax.f32 %v471_v47, 0.0 }
 0x10c   :  { %578 = vst [vmem:[%s1241_s3 + $0xe0] sm:$0xff] %v546_v48 }
 0x10d   :  { %563 = vst [vmem:[%s1241_s3 + $0x68] sm:$0xff] %v531_v49  ;;  %v421_v51 = vpop.f32.mrf.mxu2 }
 0x10e   :  { %v422_v54 = vadd.f32 %v1102_v46, %v421_v51  ;;  %v384_v55 = vpop.f32.mrf.mxu0 }
 0x10f   :  { %v385_v56 = vadd.f32 %v1102_v46, %v384_v55  ;;  %v478_v57 = vpop.f32.mrf.mxu1 }
 0x110   :  { %v511_v58 = vadd.f32 %v510_v50, %v422_v54  ;;  %v479_v59 = vadd.f32 %v478_v57, %v390_v52 }
 0x111   :  { %v474_v61 = vadd.f32 %v473_v34, %v385_v56 }
 0x112   :  { %v547_v62 = vmax.f32 %v511_v58, 0.0  ;;  %v534_v63 = vmax.f32 %v479_v59, 0.0 }
 0x113   :  { %v532_v0 = vmax.f32 %v474_v61, 0.0 }
 0x114   :  { %579 = vst [vmem:[%s1241_s3 + $0xe8] sm:$0xff] %v547_v62 }
 0x115   :  { %564 = vst [vmem:[%s1241_s3 + $0x70] sm:$0xff] %v532_v0  ;;  %v424_v1 = vpop.f32.mrf.mxu2 }
 0x116   :  { %566 = vst [vmem:[%s1241_s3 + $0x80] sm:$0xff] %v534_v63  ;;  %v425_v3 = vadd.f32 %v1102_v46, %v424_v1  ;;  %v386_v4 = vpop.f32.mrf.mxu0 }
 0x117   :  { %v387_v5 = vadd.f32 %v1102_v46, %v386_v4  ;;  %v480_v6 = vpop.f32.mrf.mxu1 }
 0x118   :  { %v514_v7 = vadd.f32 %v513_v53, %v425_v3  ;;  %v481_v8 = vadd.f32 %v480_v6, %v392_v2 }
 0x119   :  { %v476_v9 = vadd.f32 %v475_v44, %v387_v5 }
 0x11a   :  { %v548_v10 = vmax.f32 %v514_v7, 0.0  ;;  %v535_v11 = vmax.f32 %v481_v8, 0.0 }
 0x11b   :  { %v533_v12 = vmax.f32 %v476_v9, 0.0 }
 0x11c   :  { %580 = vst [vmem:[%s1241_s3 + $0xf0] sm:$0xff] %v548_v10 }
 0x11d   :  { %565 = vst [vmem:[%s1241_s3 + $0x78] sm:$0xff] %v533_v12  ;;  %v426_v60 = vpop.f32.mrf.mxu2 }
 0x11e   :  { %567 = vst [vmem:[%s1241_s3 + $0x88] sm:$0xff] %v535_v11  ;;  %v427_v13 = vadd.f32 %v1102_v46, %v426_v60 }
 0x120   :  { %v516_v15 = vadd.f32 %v515_v14, %v427_v13 }
 0x122   :  { %v549_v16 = vmax.f32 %v516_v15, 0.0 }
 0x124   :  { %581 = vst [vmem:[%s1241_s3 + $0xf8] sm:$0xff] %v549_v16 }

// kernel: forward.4
= control target key start
LH: loop header
LB: loop body
LE: loop exit
PB: predicated region body
PF: predicated region fallthrough
CT: control target
= control target key end

     0   :  { %s1396_s1 = inlined_call_operand.vmem [shape: bf16[512,128], index: 1, kind: input, shape index: {}]   ;;  %s1397_s2 = inlined_call_operand.vmem [shape: f32[1,128], index: 2, kind: input, shape index: {}]   ;;  %s1398_s0 = inlined_call_operand.vmem [shape: bf16[128,512], index: 0, kind: input, shape index: {}]   ;;  %s1399_s3 = inlined_call_operand.vmem [shape: f32[128,128], index: 3, kind: output, shape index: {}]  }
   0x1   :  { %v993_v0 = vld [vmem:[%s1396_s1 + $0x38] sm:$0xff]  ;;  %v992_v4 = vld [vmem:[%s1396_s1 + $0x30] sm:$0xff]  ;;  %v991_v8 = vld [vmem:[%s1396_s1 + $0x28] sm:$0xff] }
   0x2   :  { %v1001_v1 = vld [vmem:[%s1396_s1 + $0x78] sm:$0xff]  ;;  %466 = vmatpush.bf16.msra.mxu0 %v993_v0  ;;  %v1000_v5 = vld [vmem:[%s1396_s1 + $0x70] sm:$0xff]  ;;  %v999_v9 = vld [vmem:[%s1396_s1 + $0x68] sm:$0xff] }
   0x3   :  { %v1009_v2 = vld [vmem:[%s1396_s1 + $0xb8] sm:$0xff]  ;;  %515 = vmatpush.bf16.msra.mxu1 %v1001_v1  ;;  %v1008_v6 = vld [vmem:[%s1396_s1 + $0xb0] sm:$0xff]  ;;  %v1007_v10 = vld [vmem:[%s1396_s1 + $0xa8] sm:$0xff] }
   0x4   :  { %v1017_v3 = vld [vmem:[%s1396_s1 + $0xf8] sm:$0xff]  ;;  %564 = vmatpush.bf16.msra.mxu2 %v1009_v2  ;;  %v1016_v7 = vld [vmem:[%s1396_s1 + $0xf0] sm:$0xff]  ;;  %v1015_v11 = vld [vmem:[%s1396_s1 + $0xe8] sm:$0xff] }
   0x5   :  { %613 = vmatpush.bf16.msra.mxu3 %v1017_v3  ;;  %v990_v12 = vld [vmem:[%s1396_s1 + $0x20] sm:$0xff]  ;;  %v989_v16 = vld [vmem:[%s1396_s1 + $0x18] sm:$0xff]  ;;  %v988_v20 = vld [vmem:[%s1396_s1 + $0x10] sm:$0xff] }
   0x6   :  { %467 = vmatpush.bf16.msra.mxu0 %v992_v4  ;;  %v998_v13 = vld [vmem:[%s1396_s1 + $0x60] sm:$0xff]  ;;  %v997_v17 = vld [vmem:[%s1396_s1 + $0x58] sm:$0xff]  ;;  %v996_v21 = vld [vmem:[%s1396_s1 + $0x50] sm:$0xff] }
   0x7   :  { %516 = vmatpush.bf16.msra.mxu1 %v1000_v5  ;;  %v1006_v14 = vld [vmem:[%s1396_s1 + $0xa0] sm:$0xff]  ;;  %v1005_v18 = vld [vmem:[%s1396_s1 + $0x98] sm:$0xff]  ;;  %v1004_v22 = vld [vmem:[%s1396_s1 + $0x90] sm:$0xff] }
   0x8   :  { %565 = vmatpush.bf16.msra.mxu2 %v1008_v6  ;;  %v1014_v15 = vld [vmem:[%s1396_s1 + $0xe0] sm:$0xff]  ;;  %v1013_v19 = vld [vmem:[%s1396_s1 + $0xd8] sm:$0xff]  ;;  %v1012_v23 = vld [vmem:[%s1396_s1 + $0xd0] sm:$0xff] }
   0x9   :  { %614 = vmatpush.bf16.msra.mxu3 %v1016_v7  ;;  %v987_v24 = vld [vmem:[%s1396_s1 + $0x8] sm:$0xff]  ;;  %v986_v28 = vld [vmem:[%s1396_s1] sm:$0xff]  ;;  %v956_v33 = vld [vmem:[%s1398_s0 + $0xc] sm:$0xf0] }
   0xa   :  { %468 = vmatpush.bf16.msra.mxu0 %v991_v8  ;;  %v995_v25 = vld [vmem:[%s1396_s1 + $0x48] sm:$0xff]  ;;  %v994_v29 = vld [vmem:[%s1396_s1 + $0x40] sm:$0xff]  ;;  %v702_v35 = vld [vmem:[%s1398_s0 + $0x10] sm:$0xf0] }
   0xb   :  { %517 = vmatpush.bf16.msra.mxu1 %v999_v9  ;;  %v1003_v26 = vld [vmem:[%s1396_s1 + $0x88] sm:$0xff]  ;;  %v1002_v30 = vld [vmem:[%s1396_s1 + $0x80] sm:$0xff]  ;;  %v957_v37 = vld [vmem:[%s1398_s0 + $0x14] sm:$0xf0] }
   0xc   :  { %566 = vmatpush.bf16.msra.mxu2 %v1007_v10  ;;  %v1011_v27 = vld [vmem:[%s1396_s1 + $0xc8] sm:$0xff]  ;;  %v1010_v31 = vld [vmem:[%s1396_s1 + $0xc0] sm:$0xff]  ;;  %v710_v39 = vld [vmem:[%s1398_s0 + $0x18] sm:$0xf0] }
   0xd   :  { %615 = vmatpush.bf16.msra.mxu3 %v1015_v11  ;;  %v700_v32 = vld [vmem:[%s1398_s0] sm:$0xf]  ;;  %v954_v34 = vld [vmem:[%s1398_s0 + $0x4] sm:$0xf]  ;;  %v708_v36 = vld [vmem:[%s1398_s0 + $0x8] sm:$0xf] }
   0xe   :  { %469 = vmatpush.bf16.msra.mxu0 %v990_v12  ;;  %v955_v38 = vld [vmem:[%s1398_s0 + $0xc] sm:$0xf]  ;;  %v701_v40 = vor.u32 %v956_v33, %v700_v32  ;;  %v705_v41 = vor.u32 %v954_v34, %v702_v35  ;;  %v709_v42 = vor.u32 %v957_v37, %v708_v36  ;;  %v716_v44 = vld [vmem:[%s1398_s0 + $0x20] sm:$0xf]  ;;  %v960_v45 = vld [vmem:[%s1398_s0 + $0x2c] sm:$0xf0] }
   0xf   :  { %518 = vmatpush.bf16.msra.mxu1 %v998_v13  ;;  %v713_v43 = vor.u32 %v955_v38, %v710_v39  ;;  %v958_v46 = vld [vmem:[%s1398_s0 + $0x24] sm:$0xf]  ;;  %v718_v47 = vld [vmem:[%s1398_s0 + $0x30] sm:$0xf0]  ;;  %v724_v48 = vld [vmem:[%s1398_s0 + $0x28] sm:$0xf]  ;;  %v717_v52 = vor.u32 %v960_v45, %v716_v44 }
  0x10   :  { %567 = vmatpush.bf16.msra.mxu2 %v1006_v14  ;;  %v961_v49 = vld [vmem:[%s1398_s0 + $0x34] sm:$0xf0]  ;;  %v959_v50 = vld [vmem:[%s1398_s0 + $0x2c] sm:$0xf]  ;;  %v726_v51 = vld [vmem:[%s1398_s0 + $0x38] sm:$0xf0]  ;;  %v721_v53 = vor.u32 %v958_v46, %v718_v47 }
  0x11   :  { %616 = vmatpush.bf16.msra.mxu3 %v1014_v15  ;;  %v725_v54 = vor.u32 %v961_v49, %v724_v48  ;;  %v729_v55 = vor.u32 %v959_v50, %v726_v51  ;;  %v732_v56 = vld [vmem:[%s1398_s0 + $0x40] sm:$0xf]  ;;  %v964_v57 = vld [vmem:[%s1398_s0 + $0x4c] sm:$0xf0]  ;;  %v962_v58 = vld [vmem:[%s1398_s0 + $0x44] sm:$0xf] }
  0x12   :  { %470 = vmatpush.bf16.msra.mxu0 %v989_v16  ;;  %v734_v59 = vld [vmem:[%s1398_s0 + $0x50] sm:$0xf0]  ;;  %v740_v60 = vld [vmem:[%s1398_s0 + $0x48] sm:$0xf]  ;;  %v965_v61 = vld [vmem:[%s1398_s0 + $0x54] sm:$0xf0]  ;;  %v733_v0 = vor.u32 %v964_v57, %v732_v56 }
  0x13   :  { %519 = vmatpush.bf16.msra.mxu1 %v997_v17  ;;  %v963_v62 = vld [vmem:[%s1398_s0 + $0x4c] sm:$0xf]  ;;  %v742_v63 = vld [vmem:[%s1398_s0 + $0x58] sm:$0xf0]  ;;  %v737_v1 = vor.u32 %v962_v58, %v734_v59  ;;  %v741_v2 = vor.u32 %v965_v61, %v740_v60  ;;  %v748_v4 = vld [vmem:[%s1398_s0 + $0x60] sm:$0xf] }
  0x14   :  { %568 = vmatpush.bf16.msra.mxu2 %v1005_v18  ;;  %v745_v3 = vor.u32 %v963_v62, %v742_v63  ;;  %v968_v5 = vld [vmem:[%s1398_s0 + $0x6c] sm:$0xf0]  ;;  %v966_v6 = vld [vmem:[%s1398_s0 + $0x64] sm:$0xf]  ;;  %v750_v7 = vld [vmem:[%s1398_s0 + $0x70] sm:$0xf0] }
  0x15   :  { %617 = vmatpush.bf16.msra.mxu3 %v1013_v19  ;;  %v756_v8 = vld [vmem:[%s1398_s0 + $0x68] sm:$0xf]  ;;  %v969_v9 = vld [vmem:[%s1398_s0 + $0x74] sm:$0xf0]  ;;  %v967_v10 = vld [vmem:[%s1398_s0 + $0x6c] sm:$0xf]  ;;  %v749_v12 = vor.u32 %v968_v5, %v748_v4  ;;  %v753_v13 = vor.u32 %v966_v6, %v750_v7 }
  0x16   :  { %471 = vmatpush.bf16.msra.mxu0 %v988_v20  ;;  %v758_v11 = vld [vmem:[%s1398_s0 + $0x78] sm:$0xf0]  ;;  %v757_v14 = vor.u32 %v969_v9, %v756_v8  ;;  %v764_v16 = vld [vmem:[%s1398_s0 + $0x80] sm:$0xf]  ;;  %v972_v17 = vld [vmem:[%s1398_s0 + $0x8c] sm:$0xf0] }
  0x17   :  { %520 = vmatpush.bf16.msra.mxu1 %v996_v21  ;;  %v761_v15 = vor.u32 %v967_v10, %v758_v11  ;;  %v970_v18 = vld [vmem:[%s1398_s0 + $0x84] sm:$0xf]  ;;  %v766_v19 = vld [vmem:[%s1398_s0 + $0x90] sm:$0xf0]  ;;  %v772_v20 = vld [vmem:[%s1398_s0 + $0x88] sm:$0xf] }
  0x18   :  { %569 = vmatpush.bf16.msra.mxu2 %v1004_v22  ;;  %v973_v21 = vld [vmem:[%s1398_s0 + $0x94] sm:$0xf0]  ;;  %v971_v22 = vld [vmem:[%s1398_s0 + $0x8c] sm:$0xf]  ;;  %v788_v32 = vld [vmem:[%s1398_s0 + $0xa8] sm:$0xf] }
  0x19   :  { %618 = vmatpush.bf16.msra.mxu3 %v1012_v23  ;;  %v774_v23 = vld [vmem:[%s1398_s0 + $0x98] sm:$0xf0]  ;;  %v977_v33 = vld [vmem:[%s1398_s0 + $0xb4] sm:$0xf0]  ;;  %v975_v34 = vld [vmem:[%s1398_s0 + $0xac] sm:$0xf] }
  0x1a   :  { %472 = vmatpush.bf16.msra.mxu0 %v987_v24  ;;  %v765_v24 = vor.u32 %v972_v17, %v764_v16  ;;  %v790_v35 = vld [vmem:[%s1398_s0 + $0xb8] sm:$0xf0]  ;;  %v789_v38 = vor.u32 %v977_v33, %v788_v32  ;;  %v804_v44 = vld [vmem:[%s1398_s0 + $0xc8] sm:$0xf]  ;;  %v981_v45 = vld [vmem:[%s1398_s0 + $0xd4] sm:$0xf0] }
  0x1b   :  { %521 = vmatpush.bf16.msra.mxu1 %v995_v25  ;;  %v769_v25 = vor.u32 %v970_v18, %v766_v19  ;;  %v793_v39 = vor.u32 %v975_v34, %v790_v35  ;;  %v979_v46 = vld [vmem:[%s1398_s0 + $0xcc] sm:$0xf]  ;;  %v806_v47 = vld [vmem:[%s1398_s0 + $0xd8] sm:$0xf0]  ;;  %v805_v50 = vor.u32 %v981_v45, %v804_v44  ;;  %v820_v56 = vld [vmem:[%s1398_s0 + $0xe8] sm:$0xf] }
  0x1c   :  { %570 = vmatpush.bf16.msra.mxu2 %v1003_v26  ;;  %v773_v26 = vor.u32 %v973_v21, %v772_v20  ;;  %v809_v51 = vor.u32 %v979_v46, %v806_v47  ;;  %v985_v57 = vld [vmem:[%s1398_s0 + $0xf4] sm:$0xf0]  ;;  %v983_v58 = vld [vmem:[%s1398_s0 + $0xec] sm:$0xf]  ;;  %v822_v59 = vld [vmem:[%s1398_s0 + $0xf8] sm:$0xf0] }
  0x1d   :  { %619 = vmatpush.bf16.msra.mxu3 %v1011_v27  ;;  %v777_v27 = vor.u32 %v971_v22, %v774_v23  ;;  %v821_v62 = vor.u32 %v985_v57, %v820_v56  ;;  %v825_v63 = vor.u32 %v983_v58, %v822_v59 }
  0x1e   :  { %473 = vmatpush.bf16.msra.mxu0 %v986_v28  ;;  %v780_v28 = vld [vmem:[%s1398_s0 + $0xa0] sm:$0xf] }
  0x1f   :  { %522 = vmatpush.bf16.msra.mxu1 %v994_v29  ;;  %v976_v29 = vld [vmem:[%s1398_s0 + $0xac] sm:$0xf0] }
  0x20   :  { %571 = vmatpush.bf16.msra.mxu2 %v1002_v30  ;;  %v974_v30 = vld [vmem:[%s1398_s0 + $0xa4] sm:$0xf]  ;;  %v781_v36 = vor.u32 %v976_v29, %v780_v28 }
  0x21   :  { %620 = vmatpush.bf16.msra.mxu3 %v1010_v31  ;;  %474 = vmatmul.bf16.vlgmr.msra.gmra.mxu0 %v701_v40  ;;  %v782_v31 = vld [vmem:[%s1398_s0 + $0xb0] sm:$0xf0]  ;;  %v796_v40 = vld [vmem:[%s1398_s0 + $0xc0] sm:$0xf] }
  0x22   :  { %523 = vmatmul.bf16.vlgmr.msra.gmra.mxu1 %v705_v41  ;;  %v785_v37 = vor.u32 %v974_v30, %v782_v31  ;;  %v980_v41 = vld [vmem:[%s1398_s0 + $0xcc] sm:$0xf0] }
  0x23   :  { %572 = vmatmul.bf16.vlgmr.msra.gmra.mxu2 %v709_v42  ;;  %v978_v42 = vld [vmem:[%s1398_s0 + $0xc4] sm:$0xf]  ;;  %v797_v48 = vor.u32 %v980_v41, %v796_v40 }
  0x24   :  { %621 = vmatmul.bf16.vlgmr.msra.gmra.mxu3 %v713_v43  ;;  %v798_v43 = vld [vmem:[%s1398_s0 + $0xd0] sm:$0xf0] }
  0x25   :  { %v801_v49 = vor.u32 %v978_v42, %v798_v43 }
  0x31   :  { %479 = vmatmul.bf16.gmra.mxu0 %v717_v52  ;;  %v812_v52 = vld [vmem:[%s1398_s0 + $0xe0] sm:$0xf] }
  0x32   :  { %528 = vmatmul.bf16.gmra.mxu1 %v721_v53  ;;  %v984_v53 = vld [vmem:[%s1398_s0 + $0xec] sm:$0xf0] }
  0x33   :  { %577 = vmatmul.bf16.gmra.mxu2 %v725_v54  ;;  %v982_v54 = vld [vmem:[%s1398_s0 + $0xe4] sm:$0xf]  ;;  %v813_v60 = vor.u32 %v984_v53, %v812_v52 }
  0x34   :  { %626 = vmatmul.bf16.gmra.mxu3 %v729_v55  ;;  %v814_v55 = vld [vmem:[%s1398_s0 + $0xf0] sm:$0xf0] }
  0x35   :  { %v817_v61 = vor.u32 %v982_v54, %v814_v55 }
  0x41   :  { %484 = vmatmul.bf16.gmra.mxu0 %v733_v0  ;;  %v1330_v0 = vld [vmem:[%s1397_s2] ss:$0 sm:$0xff] }
  0x42   :  { %533 = vmatmul.bf16.gmra.mxu1 %v737_v1 }
  0x43   :  { %582 = vmatmul.bf16.gmra.mxu2 %v741_v2 }
  0x44   :  { %631 = vmatmul.bf16.gmra.mxu3 %v745_v3 }
  0x51   :  { %489 = vmatmul.bf16.gmra.mxu0 %v749_v12 }
  0x52   :  { %538 = vmatmul.bf16.gmra.mxu1 %v753_v13 }
  0x53   :  { %587 = vmatmul.bf16.gmra.mxu2 %v757_v14 }
  0x54   :  { %636 = vmatmul.bf16.gmra.mxu3 %v761_v15 }
  0x61   :  { %494 = vmatmul.bf16.gmra.mxu0 %v765_v24 }
  0x62   :  { %543 = vmatmul.bf16.gmra.mxu1 %v769_v25 }
  0x63   :  { %592 = vmatmul.bf16.gmra.mxu2 %v773_v26 }
  0x64   :  { %641 = vmatmul.bf16.gmra.mxu3 %v777_v27 }
  0x71   :  { %499 = vmatmul.bf16.gmra.mxu0 %v781_v36 }
  0x72   :  { %548 = vmatmul.bf16.gmra.mxu1 %v785_v37 }
  0x73   :  { %597 = vmatmul.bf16.gmra.mxu2 %v789_v38 }
  0x74   :  { %646 = vmatmul.bf16.gmra.mxu3 %v793_v39 }
  0x81   :  { %504 = vmatmul.bf16.gmra.mxu0 %v797_v48 }
  0x82   :  { %553 = vmatmul.bf16.gmra.mxu1 %v801_v49 }
  0x83   :  { %602 = vmatmul.bf16.gmra.mxu2 %v805_v50 }
  0x84   :  { %651 = vmatmul.bf16.gmra.mxu3 %v809_v51 }
  0x91   :  { %509 = vmatmul.bf16.gmra.mxu0 %v813_v60 }
  0x92   :  { %558 = vmatmul.bf16.gmra.mxu1 %v817_v61 }
  0x93   :  { %607 = vmatmul.bf16.gmra.mxu2 %v821_v62 }
  0x94   :  { %656 = vmatmul.bf16.gmra.mxu3 %v825_v63 }
  0x9e   :  { %v475_v1 = vpop.f32.mrf.mxu0 }
  0x9f   :  { %v524_v2 = vpop.f32.mrf.mxu1  ;;  %v476_v3 = vadd.f32 %v1330_v0, %v475_v1 }
  0xa1   :  { %v525_v4 = vadd.f32 %v524_v2, %v476_v3 }
  0xa6   :  { %v573_v5 = vpop.f32.mrf.mxu2  ;;  %v477_v8 = vpop.f32.mrf.mxu0 }
  0xa7   :  { %v622_v6 = vpop.f32.mrf.mxu3  ;;  %v574_v7 = vadd.f32 %v573_v5, %v525_v4  ;;  %v526_v9 = vpop.f32.mrf.mxu1  ;;  %v478_v11 = vadd.f32 %v1330_v0, %v477_v8 }
  0xa9   :  { %v623_v10 = vadd.f32 %v622_v6, %v574_v7  ;;  %v527_v13 = vadd.f32 %v526_v9, %v478_v11 }
  0xab   :  { %v662_v12 = vmax.f32 %v623_v10, 0.0 }
  0xad   :  { %678 = vst [vmem:[%s1399_s3] sm:$0xff] %v662_v12 }
  0xae   :  { %v575_v14 = vpop.f32.mrf.mxu2  ;;  %v480_v17 = vpop.f32.mrf.mxu0 }
  0xaf   :  { %v624_v15 = vpop.f32.mrf.mxu3  ;;  %v576_v16 = vadd.f32 %v575_v14, %v527_v13  ;;  %v529_v18 = vpop.f32.mrf.mxu1  ;;  %v481_v19 = vadd.f32 %v1330_v0, %v480_v17 }
  0xb1   :  { %v625_v20 = vadd.f32 %v624_v15, %v576_v16  ;;  %v530_v22 = vadd.f32 %v529_v18, %v481_v19 }
  0xb3   :  { %v663_v21 = vmax.f32 %v625_v20, 0.0 }
  0xb5   :  { %679 = vst [vmem:[%s1399_s3 + $0x8] sm:$0xff] %v663_v21 }
  0xb6   :  { %v578_v23 = vpop.f32.mrf.mxu2  ;;  %v482_v26 = vpop.f32.mrf.mxu0 }
  0xb7   :  { %v627_v24 = vpop.f32.mrf.mxu3  ;;  %v579_v25 = vadd.f32 %v578_v23, %v530_v22  ;;  %v531_v27 = vpop.f32.mrf.mxu1  ;;  %v483_v29 = vadd.f32 %v1330_v0, %v482_v26 }
  0xb9   :  { %v628_v28 = vadd.f32 %v627_v24, %v579_v25  ;;  %v532_v31 = vadd.f32 %v531_v27, %v483_v29 }
  0xbb   :  { %v664_v30 = vmax.f32 %v628_v28, 0.0 }
  0xbd   :  { %680 = vst [vmem:[%s1399_s3 + $0x10] sm:$0xff] %v664_v30 }
  0xbe   :  { %v580_v32 = vpop.f32.mrf.mxu2  ;;  %v485_v35 = vpop.f32.mrf.mxu0 }
  0xbf   :  { %v629_v33 = vpop.f32.mrf.mxu3  ;;  %v581_v34 = vadd.f32 %v580_v32, %v532_v31  ;;  %v534_v36 = vpop.f32.mrf.mxu1  ;;  %v486_v37 = vadd.f32 %v1330_v0, %v485_v35 }
  0xc1   :  { %v630_v38 = vadd.f32 %v629_v33, %v581_v34  ;;  %v535_v40 = vadd.f32 %v534_v36, %v486_v37 }
  0xc3   :  { %v665_v39 = vmax.f32 %v630_v38, 0.0 }
  0xc5   :  { %681 = vst [vmem:[%s1399_s3 + $0x18] sm:$0xff] %v665_v39 }
  0xc6   :  { %v583_v41 = vpop.f32.mrf.mxu2  ;;  %v487_v44 = vpop.f32.mrf.mxu0 }
  0xc7   :  { %v632_v42 = vpop.f32.mrf.mxu3  ;;  %v584_v43 = vadd.f32 %v583_v41, %v535_v40  ;;  %v536_v45 = vpop.f32.mrf.mxu1  ;;  %v488_v47 = vadd.f32 %v1330_v0, %v487_v44 }
  0xc9   :  { %v633_v46 = vadd.f32 %v632_v42, %v584_v43  ;;  %v537_v49 = vadd.f32 %v536_v45, %v488_v47 }
  0xcb   :  { %v666_v48 = vmax.f32 %v633_v46, 0.0 }
  0xcd   :  { %682 = vst [vmem:[%s1399_s3 + $0x20] sm:$0xff] %v666_v48 }
  0xce   :  { %v585_v50 = vpop.f32.mrf.mxu2  ;;  %v490_v53 = vpop.f32.mrf.mxu0 }
  0xcf   :  { %v634_v51 = vpop.f32.mrf.mxu3  ;;  %v586_v52 = vadd.f32 %v585_v50, %v537_v49  ;;  %v539_v54 = vpop.f32.mrf.mxu1  ;;  %v491_v55 = vadd.f32 %v1330_v0, %v490_v53 }
  0xd1   :  { %v635_v56 = vadd.f32 %v634_v51, %v586_v52  ;;  %v540_v58 = vadd.f32 %v539_v54, %v491_v55 }
  0xd3   :  { %v667_v57 = vmax.f32 %v635_v56, 0.0 }
  0xd5   :  { %683 = vst [vmem:[%s1399_s3 + $0x28] sm:$0xff] %v667_v57 }
  0xd6   :  { %v588_v59 = vpop.f32.mrf.mxu2  ;;  %v492_v62 = vpop.f32.mrf.mxu0 }
  0xd7   :  { %v637_v60 = vpop.f32.mrf.mxu3  ;;  %v589_v61 = vadd.f32 %v588_v59, %v540_v58  ;;  %v541_v63 = vpop.f32.mrf.mxu1  ;;  %v493_v2 = vadd.f32 %v1330_v0, %v492_v62 }
  0xd9   :  { %v638_v1 = vadd.f32 %v637_v60, %v589_v61  ;;  %v542_v4 = vadd.f32 %v541_v63, %v493_v2 }
  0xdb   :  { %v668_v3 = vmax.f32 %v638_v1, 0.0 }
  0xdd   :  { %684 = vst [vmem:[%s1399_s3 + $0x30] sm:$0xff] %v668_v3 }
  0xde   :  { %v590_v5 = vpop.f32.mrf.mxu2  ;;  %v495_v8 = vpop.f32.mrf.mxu0 }
  0xdf   :  { %v639_v6 = vpop.f32.mrf.mxu3  ;;  %v591_v7 = vadd.f32 %v590_v5, %v542_v4  ;;  %v544_v9 = vpop.f32.mrf.mxu1  ;;  %v496_v10 = vadd.f32 %v1330_v0, %v495_v8 }
  0xe1   :  { %v640_v11 = vadd.f32 %v639_v6, %v591_v7  ;;  %v545_v13 = vadd.f32 %v544_v9, %v496_v10 }
  0xe3   :  { %v669_v12 = vmax.f32 %v640_v11, 0.0 }
  0xe5   :  { %685 = vst [vmem:[%s1399_s3 + $0x38] sm:$0xff] %v669_v12 }
  0xe6   :  { %v593_v14 = vpop.f32.mrf.mxu2  ;;  %v497_v17 = vpop.f32.mrf.mxu0 }
  0xe7   :  { %v642_v15 = vpop.f32.mrf.mxu3  ;;  %v594_v16 = vadd.f32 %v593_v14, %v545_v13  ;;  %v546_v18 = vpop.f32.mrf.mxu1  ;;  %v498_v20 = vadd.f32 %v1330_v0, %v497_v17 }
  0xe9   :  { %v643_v19 = vadd.f32 %v642_v15, %v594_v16  ;;  %v547_v22 = vadd.f32 %v546_v18, %v498_v20 }
  0xeb   :  { %v670_v21 = vmax.f32 %v643_v19, 0.0 }
  0xed   :  { %686 = vst [vmem:[%s1399_s3 + $0x40] sm:$0xff] %v670_v21 }
  0xee   :  { %v595_v23 = vpop.f32.mrf.mxu2  ;;  %v500_v26 = vpop.f32.mrf.mxu0 }
  0xef   :  { %v644_v24 = vpop.f32.mrf.mxu3  ;;  %v596_v25 = vadd.f32 %v595_v23, %v547_v22  ;;  %v549_v27 = vpop.f32.mrf.mxu1  ;;  %v501_v28 = vadd.f32 %v1330_v0, %v500_v26 }
  0xf1   :  { %v645_v29 = vadd.f32 %v644_v24, %v596_v25  ;;  %v550_v31 = vadd.f32 %v549_v27, %v501_v28 }
  0xf3   :  { %v671_v30 = vmax.f32 %v645_v29, 0.0 }
  0xf5   :  { %687 = vst [vmem:[%s1399_s3 + $0x48] sm:$0xff] %v671_v30 }
  0xf6   :  { %v598_v32 = vpop.f32.mrf.mxu2  ;;  %v502_v35 = vpop.f32.mrf.mxu0 }
  0xf7   :  { %v647_v33 = vpop.f32.mrf.mxu3  ;;  %v599_v34 = vadd.f32 %v598_v32, %v550_v31  ;;  %v551_v36 = vpop.f32.mrf.mxu1  ;;  %v503_v38 = vadd.f32 %v1330_v0, %v502_v35 }
  0xf9   :  { %v648_v37 = vadd.f32 %v647_v33, %v599_v34  ;;  %v552_v40 = vadd.f32 %v551_v36, %v503_v38 }
  0xfb   :  { %v672_v39 = vmax.f32 %v648_v37, 0.0 }
  0xfd   :  { %688 = vst [vmem:[%s1399_s3 + $0x50] sm:$0xff] %v672_v39 }
  0xfe   :  { %v600_v41 = vpop.f32.mrf.mxu2  ;;  %v505_v44 = vpop.f32.mrf.mxu0 }
  0xff   :  { %v649_v42 = vpop.f32.mrf.mxu3  ;;  %v601_v43 = vadd.f32 %v600_v41, %v552_v40  ;;  %v554_v45 = vpop.f32.mrf.mxu1  ;;  %v506_v46 = vadd.f32 %v1330_v0, %v505_v44 }
 0x101   :  { %v650_v47 = vadd.f32 %v649_v42, %v601_v43  ;;  %v555_v49 = vadd.f32 %v554_v45, %v506_v46 }
 0x103   :  { %v673_v48 = vmax.f32 %v650_v47, 0.0 }
 0x105   :  { %689 = vst [vmem:[%s1399_s3 + $0x58] sm:$0xff] %v673_v48 }
 0x106   :  { %v603_v50 = vpop.f32.mrf.mxu2  ;;  %v507_v53 = vpop.f32.mrf.mxu0 }
 0x107   :  { %v652_v51 = vpop.f32.mrf.mxu3  ;;  %v604_v52 = vadd.f32 %v603_v50, %v555_v49  ;;  %v556_v54 = vpop.f32.mrf.mxu1  ;;  %v508_v56 = vadd.f32 %v1330_v0, %v507_v53 }
 0x109   :  { %v653_v55 = vadd.f32 %v652_v51, %v604_v52  ;;  %v557_v58 = vadd.f32 %v556_v54, %v508_v56 }
 0x10b   :  { %v674_v57 = vmax.f32 %v653_v55, 0.0 }
 0x10d   :  { %690 = vst [vmem:[%s1399_s3 + $0x60] sm:$0xff] %v674_v57 }
 0x10e   :  { %v605_v59 = vpop.f32.mrf.mxu2  ;;  %v510_v62 = vpop.f32.mrf.mxu0 }
 0x10f   :  { %v654_v60 = vpop.f32.mrf.mxu3  ;;  %v606_v61 = vadd.f32 %v605_v59, %v557_v58  ;;  %v511_v63 = vadd.f32 %v1330_v0, %v510_v62  ;;  %v559_v2 = vpop.f32.mrf.mxu1 }
 0x111   :  { %v655_v1 = vadd.f32 %v654_v60, %v606_v61  ;;  %v560_v4 = vadd.f32 %v559_v2, %v511_v63 }
 0x113   :  { %v675_v3 = vmax.f32 %v655_v1, 0.0 }
 0x115   :  { %691 = vst [vmem:[%s1399_s3 + $0x68] sm:$0xff] %v675_v3 }
 0x116   :  { %v608_v5 = vpop.f32.mrf.mxu2  ;;  %v512_v8 = vpop.f32.mrf.mxu0 }
 0x117   :  { %v657_v6 = vpop.f32.mrf.mxu3  ;;  %v609_v7 = vadd.f32 %v608_v5, %v560_v4  ;;  %v513_v10 = vadd.f32 %v1330_v0, %v512_v8  ;;  %v561_v12 = vpop.f32.mrf.mxu1 }
 0x119   :  { %v658_v9 = vadd.f32 %v657_v6, %v609_v7  ;;  %v562_v13 = vadd.f32 %v561_v12, %v513_v10 }
 0x11b   :  { %v676_v11 = vmax.f32 %v658_v9, 0.0 }
 0x11d   :  { %692 = vst [vmem:[%s1399_s3 + $0x70] sm:$0xff] %v676_v11 }
 0x11e   :  { %v610_v14 = vpop.f32.mrf.mxu2 }
 0x11f   :  { %v611_v15 = vadd.f32 %v610_v14, %v562_v13  ;;  %v659_v16 = vpop.f32.mrf.mxu3 }
 0x121   :  { %v660_v17 = vadd.f32 %v659_v16, %v611_v15 }
 0x123   :  { %v677_v18 = vmax.f32 %v660_v17, 0.0 }
 0x125   :  { %693 = vst [vmem:[%s1399_s3 + $0x78] sm:$0xff] %v677_v18 }

// kernel: forward.5
= control target key start
LH: loop header
LB: loop body
LE: loop exit
PB: predicated region body
PF: predicated region fallthrough
CT: control target
= control target key end

     0   :  { %vm555_vm0 = vcmask 523264   ;;  %s1755_s1 = inlined_call_operand.vmem [shape: bf16[576,128], index: 1, kind: input, shape index: {}]   ;;  %s1756_s2 = inlined_call_operand.vmem [shape: f32[1,128], index: 2, kind: input, shape index: {}]   ;;  %s1757_s0 = inlined_call_operand.vmem [shape: bf16[128,576], index: 0, kind: input, shape index: {}]   ;;  %s1758_s3 = inlined_call_operand.vmem [shape: f32[128,128], index: 3, kind: output, shape index: {}]  }
   0x1   :  { %v1220_v0 = vld [vmem:[%s1755_s1 + $0x38] sm:$0xff]  ;;  %v1219_v1 = vld [vmem:[%s1755_s1 + $0x30] sm:$0xff]  ;;  %v1218_v2 = vld [vmem:[%s1755_s1 + $0x28] sm:$0xff] }
   0x2   :  { %1249 = vmatpush.bf16.msra.mxu1 %v1220_v0  ;;  %1250 = vmatpush.bf16.msra.mxu2 %v1220_v0  ;;  %v1217_v3 = vld [vmem:[%s1755_s1 + $0x20] sm:$0xff]  ;;  %v1216_v4 = vld [vmem:[%s1755_s1 + $0x18] sm:$0xff]  ;;  %v1215_v5 = vld [vmem:[%s1755_s1 + $0x10] sm:$0xff] }
   0x3   :  { %1251 = vmatpush.bf16.msra.mxu3 %v1220_v0  ;;  %580 = vmatpush.bf16.msra.mxu0 %v1220_v0  ;;  %v1214_v6 = vld [vmem:[%s1755_s1 + $0x8] sm:$0xff]  ;;  %v1213_v7 = vld [vmem:[%s1755_s1] sm:$0xff]  ;;  %v903_v8 = vld [vmem:[%s1757_s0 + $0x50] sm:$0xf] }
   0x4   :  { %v1185_v9 = vld [vmem:[%s1757_s0 + $0x60] sm:$0xf0]  ;;  %v943_v10 = vld [vmem:[%s1757_s0 + $0xa0] sm:$0xf]  ;;  %v1195_v11 = vld [vmem:[%s1757_s0 + $0xb0] sm:$0xf0] }
   0x5   :  { %v983_v12 = vld [vmem:[%s1757_s0 + $0xf0] sm:$0xf]  ;;  %v1205_v13 = vld [vmem:[%s1757_s0 + $0x100] sm:$0xf0]  ;;  %v863_v14 = vld [vmem:[%s1757_s0] sm:$0xf]  ;;  %v904_v18 = vor.u32 %v1185_v9, %v903_v8  ;;  %v944_v19 = vor.u32 %v1195_v11, %v943_v10 }
   0x6   :  { %1252 = vmatpush.bf16.msra.mxu1 %v1219_v1  ;;  %1253 = vmatpush.bf16.msra.mxu2 %v1219_v1  ;;  %v1175_v15 = vld [vmem:[%s1757_s0 + $0x10] sm:$0xf0]  ;;  %v1236_v16 = vld [vmem:[%s1755_s1 + $0xb8] sm:$0xff]  ;;  %v984_v20 = vor.u32 %v1205_v13, %v983_v12  ;;  %v1234_v28 = vld [vmem:[%s1755_s1 + $0xa8] sm:$0xff] }
   0x7   :  { %1254 = vmatpush.bf16.msra.mxu3 %v1219_v1  ;;  %581 = vmatpush.bf16.msra.mxu0 %v1219_v1  ;;  %v1228_v17 = vld [vmem:[%s1755_s1 + $0x78] sm:$0xff]  ;;  %v864_v21 = vor.u32 %v1175_v15, %v863_v14  ;;  %v1235_v24 = vld [vmem:[%s1755_s1 + $0xb0] sm:$0xff]  ;;  %v1226_v29 = vld [vmem:[%s1755_s1 + $0x68] sm:$0xff] }
   0x8   :  { %v1244_v22 = vld [vmem:[%s1755_s1 + $0xf8] sm:$0xff]  ;;  %v1227_v25 = vld [vmem:[%s1755_s1 + $0x70] sm:$0xff]  ;;  %v1242_v30 = vld [vmem:[%s1755_s1 + $0xe8] sm:$0xff] }
   0x9   :  { %v1248_v23 = vld [vmem:[%s1755_s1 + $0x118] sm:$0xff]  ;;  %v1243_v26 = vld [vmem:[%s1755_s1 + $0xf0] sm:$0xff]  ;;  %v1246_v31 = vld [vmem:[%s1755_s1 + $0x108] sm:$0xff] }
   0xa   :  { %1255 = vmatpush.bf16.msra.mxu1 %v1218_v2  ;;  %1256 = vmatpush.bf16.msra.mxu2 %v1218_v2  ;;  %v1247_v27 = vld [vmem:[%s1755_s1 + $0x110] sm:$0xff]  ;;  %v1233_v32 = vld [vmem:[%s1755_s1 + $0xa0] sm:$0xff]  ;;  %v923_v35 = vld [vmem:[%s1757_s0 + $0x78] sm:$0xf] }
   0xb   :  { %1257 = vmatpush.bf16.msra.mxu3 %v1218_v2  ;;  %582 = vmatpush.bf16.msra.mxu0 %v1218_v2  ;;  %v1225_v33 = vld [vmem:[%s1755_s1 + $0x60] sm:$0xff]  ;;  %v1190_v36 = vld [vmem:[%s1757_s0 + $0x88] sm:$0xf0]  ;;  %v963_v37 = vld [vmem:[%s1757_s0 + $0xc8] sm:$0xf] }
   0xc   :  { %v1241_v34 = vld [vmem:[%s1755_s1 + $0xe0] sm:$0xff]  ;;  %v1200_v38 = vld [vmem:[%s1757_s0 + $0xd8] sm:$0xf0]  ;;  %v1003_v39 = vld [vmem:[%s1757_s0 + $0x118] sm:$0xf]  ;;  %v924_v46 = vor.u32 %v1190_v36, %v923_v35 }
   0xd   :  { %v1210_v40 = vld [vmem:[%s1757_s0 + $0x128] sm:$0xf0]  ;;  %v883_v41 = vld [vmem:[%s1757_s0 + $0x28] sm:$0xf]  ;;  %v1180_v42 = vld [vmem:[%s1757_s0 + $0x38] sm:$0xf0]  ;;  %v964_v47 = vor.u32 %v1200_v38, %v963_v37 }
   0xe   :  { %1258 = vmatpush.bf16.msra.mxu1 %v1217_v3  ;;  %1259 = vmatpush.bf16.msra.mxu2 %v1217_v3  ;;  %v1245_v43 = vld [vmem:[%s1755_s1 + $0x100] sm:$0xff]  ;;  %v1232_v44 = vld [vmem:[%s1755_s1 + $0x98] sm:$0xff]  ;;  %v1004_v48 = vor.u32 %v1210_v40, %v1003_v39  ;;  %v884_v49 = vor.u32 %v1180_v42, %v883_v41  ;;  %v1231_v51 = vld [vmem:[%s1755_s1 + $0x90] sm:$0xff] }
   0xf   :  { %1260 = vmatpush.bf16.msra.mxu3 %v1217_v3  ;;  %583 = vmatpush.bf16.msra.mxu0 %v1217_v3  ;;  %v1224_v45 = vld [vmem:[%s1755_s1 + $0x58] sm:$0xff]  ;;  %v1223_v52 = vld [vmem:[%s1755_s1 + $0x50] sm:$0xff]  ;;  %v1230_v54 = vld [vmem:[%s1755_s1 + $0x88] sm:$0xff] }
  0x10   :  { %v1240_v50 = vld [vmem:[%s1755_s1 + $0xd8] sm:$0xff]  ;;  %v1239_v53 = vld [vmem:[%s1755_s1 + $0xd0] sm:$0xff]  ;;  %v1222_v55 = vld [vmem:[%s1755_s1 + $0x48] sm:$0xff] }
  0x11   :  { %v1238_v56 = vld [vmem:[%s1755_s1 + $0xc8] sm:$0xff]  ;;  %v1229_v57 = vld [vmem:[%s1755_s1 + $0x80] sm:$0xff]  ;;  %v865_v61 = vld [vmem:[%s1757_s0 + $0x14] sm:$0xf0] }
  0x12   :  { %1261 = vmatpush.bf16.msra.mxu1 %v1216_v4  ;;  %1262 = vmatpush.bf16.msra.mxu2 %v1216_v4  ;;  %v1221_v58 = vld [vmem:[%s1755_s1 + $0x40] sm:$0xff]  ;;  %v871_v62 = vld [vmem:[%s1757_s0 + $0x8] sm:$0xf]  ;;  %v1176_v63 = vld [vmem:[%s1757_s0 + $0x18] sm:$0xf0] }
  0x13   :  { %1263 = vmatpush.bf16.msra.mxu3 %v1216_v4  ;;  %584 = vmatpush.bf16.msra.mxu0 %v1216_v4  ;;  %v1237_v59 = vld [vmem:[%s1755_s1 + $0xc0] sm:$0xff]  ;;  %v1174_v0 = vld [vmem:[%s1757_s0 + $0xc] sm:$0xf]  ;;  %v879_v2 = vld [vmem:[%s1757_s0 + $0x10] sm:$0xf] }
  0x14   :  { %v1173_v60 = vld [vmem:[%s1757_s0 + $0x4] sm:$0xf]  ;;  %v873_v1 = vld [vmem:[%s1757_s0 + $0x1c] sm:$0xf0]  ;;  %v1178_v8 = vld [vmem:[%s1757_s0 + $0x2c] sm:$0xf] }
  0x15   :  { %v1177_v3 = vld [vmem:[%s1757_s0 + $0x20] sm:$0xf0]  ;;  %v868_v4 = vor.u32 %v1173_v60, %v865_v61  ;;  %v885_v9 = vld [vmem:[%s1757_s0 + $0x3c] sm:$0xf0]  ;;  %v891_v10 = vld [vmem:[%s1757_s0 + $0x30] sm:$0xf] }
  0x16   :  { %1264 = vmatpush.bf16.msra.mxu1 %v1215_v5  ;;  %1265 = vmatpush.bf16.msra.mxu2 %v1215_v5  ;;  %v1181_v11 = vld [vmem:[%s1757_s0 + $0x40] sm:$0xf0]  ;;  %v1179_v12 = vld [vmem:[%s1757_s0 + $0x34] sm:$0xf]  ;;  %v893_v13 = vld [vmem:[%s1757_s0 + $0x44] sm:$0xf0] }
  0x17   :  { %1266 = vmatpush.bf16.msra.mxu3 %v1215_v5  ;;  %585 = vmatpush.bf16.msra.mxu0 %v1215_v5  ;;  %v872_v5 = vor.u32 %v1176_v63, %v871_v62  ;;  %v899_v14 = vld [vmem:[%s1757_s0 + $0x38] sm:$0xf]  ;;  %v1182_v15 = vld [vmem:[%s1757_s0 + $0x48] sm:$0xf0]  ;;  %v1191_v35 = vld [vmem:[%s1757_s0 + $0x90] sm:$0xf0] }
  0x18   :  { %v1189_v36 = vld [vmem:[%s1757_s0 + $0x84] sm:$0xf]  ;;  %v933_v37 = vld [vmem:[%s1757_s0 + $0x94] sm:$0xf0]  ;;  %v939_v38 = vld [vmem:[%s1757_s0 + $0x88] sm:$0xf] }
  0x19   :  { %v1192_v39 = vld [vmem:[%s1757_s0 + $0x98] sm:$0xf0]  ;;  %v936_v42 = vor.u32 %v1189_v36, %v933_v37  ;;  %v1199_v60 = vld [vmem:[%s1757_s0 + $0xd4] sm:$0xf]  ;;  %v973_v61 = vld [vmem:[%s1757_s0 + $0xe4] sm:$0xf0] }
  0x1a   :  { %1267 = vmatpush.bf16.msra.mxu1 %v1214_v6  ;;  %1268 = vmatpush.bf16.msra.mxu2 %v1214_v6  ;;  %v979_v62 = vld [vmem:[%s1757_s0 + $0xd8] sm:$0xf]  ;;  %v1202_v63 = vld [vmem:[%s1757_s0 + $0xe8] sm:$0xf0] }
  0x1b   :  { %1269 = vmatpush.bf16.msra.mxu3 %v1214_v6  ;;  %586 = vmatpush.bf16.msra.mxu0 %v1214_v6  ;;  %v876_v6 = vor.u32 %v1174_v0, %v873_v1 }
  0x1e   :  { %1270 = vmatpush.bf16.msra.mxu1 %v1213_v7  ;;  %1271 = vmatpush.bf16.msra.mxu2 %v1213_v7 }
  0x1f   :  { %1272 = vmatpush.bf16.msra.mxu3 %v1213_v7  ;;  %587 = vmatpush.bf16.msra.mxu0 %v1213_v7  ;;  %v880_v7 = vor.u32 %v1177_v3, %v879_v2  ;;  %v976_v2 = vor.u32 %v1199_v60, %v973_v61  ;;  %v980_v3 = vor.u32 %v1202_v63, %v979_v62 }
  0x21   :  { %598 = vmatmul.bf16.vlgmr.msra.gmra.mxu1 %v904_v18  ;;  %608 = vmatmul.bf16.vlgmr.msra.gmra.mxu2 %v944_v19  ;;  %v896_v18 = vor.u32 %v1179_v12, %v893_v13  ;;  %v900_v19 = vor.u32 %v1182_v15, %v899_v14 }
  0x22   :  { %678 = vmatpush.bf16.msrb.mxu2 %v1236_v16  ;;  %629 = vmatpush.bf16.msrb.mxu1 %v1228_v17  ;;  %v888_v16 = vor.u32 %v1178_v8, %v885_v9  ;;  %v892_v17 = vor.u32 %v1181_v11, %v891_v10  ;;  %v1204_v8 = vld [vmem:[%s1757_s0 + $0xfc] sm:$0xf]  ;;  %v993_v9 = vld [vmem:[%s1757_s0 + $0x10c] sm:$0xf0]  ;;  %v999_v10 = vld [vmem:[%s1757_s0 + $0x100] sm:$0xf] }
  0x23   :  { %618 = vmatmul.bf16.vlgmr.msra.gmra.mxu3 %v984_v20  ;;  %588 = vmatmul.bf16.vlgmr.msra.gmra.mxu0 %v864_v21  ;;  %v1183_v20 = vld [vmem:[%s1757_s0 + $0x54] sm:$0xf]  ;;  %v905_v21 = vld [vmem:[%s1757_s0 + $0x64] sm:$0xf0]  ;;  %v996_v15 = vor.u32 %v1204_v8, %v993_v9 }
  0x24   :  { %727 = vmatpush.bf16.msrb.mxu3 %v1244_v22  ;;  %780 = vmatpush.bf16.msrb.mxu0 %v1248_v23  ;;  %v911_v22 = vld [vmem:[%s1757_s0 + $0x58] sm:$0xf]  ;;  %v1186_v23 = vld [vmem:[%s1757_s0 + $0x68] sm:$0xf0]  ;;  %v1207_v11 = vld [vmem:[%s1757_s0 + $0x110] sm:$0xf0] }
  0x26   :  { %679 = vmatpush.bf16.msrb.mxu2 %v1235_v24  ;;  %630 = vmatpush.bf16.msrb.mxu1 %v1227_v25  ;;  %v1184_v24 = vld [vmem:[%s1757_s0 + $0x5c] sm:$0xf]  ;;  %v913_v25 = vld [vmem:[%s1757_s0 + $0x6c] sm:$0xf0] }
  0x28   :  { %728 = vmatpush.bf16.msrb.mxu3 %v1243_v26  ;;  %781 = vmatpush.bf16.msrb.mxu0 %v1247_v27  ;;  %v919_v26 = vld [vmem:[%s1757_s0 + $0x60] sm:$0xf]  ;;  %v1187_v27 = vld [vmem:[%s1757_s0 + $0x70] sm:$0xf0] }
  0x2a   :  { %680 = vmatpush.bf16.msrb.mxu2 %v1234_v28  ;;  %631 = vmatpush.bf16.msrb.mxu1 %v1226_v29  ;;  %v908_v28 = vor.u32 %v1183_v20, %v905_v21  ;;  %v912_v29 = vor.u32 %v1186_v23, %v911_v22 }
  0x2c   :  { %729 = vmatpush.bf16.msrb.mxu3 %v1242_v30  ;;  %782 = vmatpush.bf16.msrb.mxu0 %v1246_v31  ;;  %v916_v30 = vor.u32 %v1184_v24, %v913_v25  ;;  %v920_v31 = vor.u32 %v1187_v27, %v919_v26  ;;  %v1208_v25 = vld [vmem:[%s1757_s0 + $0x11c] sm:$0xf]  ;;  %v1005_v26 = vld [vmem:[%s1757_s0 + $0x12c] sm:$0xf0]  ;;  %v1011_v27 = vld [vmem:[%s1757_s0 + $0x120] sm:$0xf] }
  0x2d   :  { %v1008_v36 = vor.u32 %v1208_v25, %v1005_v26 }
  0x2e   :  { %681 = vmatpush.bf16.msrb.mxu2 %v1233_v32  ;;  %632 = vmatpush.bf16.msrb.mxu1 %v1225_v33  ;;  %v1188_v32 = vld [vmem:[%s1757_s0 + $0x7c] sm:$0xf]  ;;  %v925_v33 = vld [vmem:[%s1757_s0 + $0x8c] sm:$0xf0] }
  0x2f   :  { %v928_v40 = vor.u32 %v1188_v32, %v925_v33  ;;  %v1212_v32 = vld [vmem:[%s1757_s0 + $0x138] sm:$0xf0] }
  0x30   :  { %730 = vmatpush.bf16.msrb.mxu3 %v1241_v34  ;;  %783 = vmatpush.bf16.msrb.mxu0 %v1245_v43  ;;  %v931_v34 = vld [vmem:[%s1757_s0 + $0x80] sm:$0xf]  ;;  %v940_v43 = vor.u32 %v1192_v39, %v939_v38 }
  0x31   :  { %603 = vmatmul.bf16.gmra.mxu1 %v924_v46  ;;  %613 = vmatmul.bf16.gmra.mxu2 %v964_v47  ;;  %v932_v41 = vor.u32 %v1191_v35, %v931_v34  ;;  %v951_v46 = vld [vmem:[%s1757_s0 + $0xa8] sm:$0xf]  ;;  %v1196_v47 = vld [vmem:[%s1757_s0 + $0xb8] sm:$0xf0] }
  0x32   :  { %682 = vmatpush.bf16.msrb.mxu2 %v1232_v44  ;;  %633 = vmatpush.bf16.msrb.mxu1 %v1224_v45  ;;  %v1193_v44 = vld [vmem:[%s1757_s0 + $0xa4] sm:$0xf]  ;;  %v945_v45 = vld [vmem:[%s1757_s0 + $0xb4] sm:$0xf0] }
  0x33   :  { %623 = vmatmul.bf16.gmra.mxu3 %v1004_v48  ;;  %593 = vmatmul.bf16.gmra.mxu0 %v884_v49  ;;  %v1194_v48 = vld [vmem:[%s1757_s0 + $0xac] sm:$0xf]  ;;  %v953_v49 = vld [vmem:[%s1757_s0 + $0xbc] sm:$0xf0] }
  0x34   :  { %731 = vmatpush.bf16.msrb.mxu3 %v1240_v50  ;;  %v959_v50 = vld [vmem:[%s1757_s0 + $0xb0] sm:$0xf] }
  0x36   :  { %683 = vmatpush.bf16.msrb.mxu2 %v1231_v51  ;;  %634 = vmatpush.bf16.msrb.mxu1 %v1223_v52  ;;  %v1197_v51 = vld [vmem:[%s1757_s0 + $0xc0] sm:$0xf0]  ;;  %v948_v52 = vor.u32 %v1193_v44, %v945_v45 }
  0x38   :  { %732 = vmatpush.bf16.msrb.mxu3 %v1239_v53  ;;  %v952_v53 = vor.u32 %v1196_v47, %v951_v46 }
  0x3a   :  { %684 = vmatpush.bf16.msrb.mxu2 %v1230_v54  ;;  %635 = vmatpush.bf16.msrb.mxu1 %v1222_v55  ;;  %v956_v54 = vor.u32 %v1194_v48, %v953_v49  ;;  %v960_v55 = vor.u32 %v1197_v51, %v959_v50 }
  0x3c   :  { %733 = vmatpush.bf16.msrb.mxu3 %v1238_v56  ;;  %v1198_v56 = vld [vmem:[%s1757_s0 + $0xcc] sm:$0xf] }
  0x3e   :  { %685 = vmatpush.bf16.msrb.mxu2 %v1229_v57  ;;  %636 = vmatpush.bf16.msrb.mxu1 %v1221_v58  ;;  %v965_v57 = vld [vmem:[%s1757_s0 + $0xdc] sm:$0xf0]  ;;  %v971_v58 = vld [vmem:[%s1757_s0 + $0xd0] sm:$0xf] }
  0x3f   :  { %v968_v0 = vor.u32 %v1198_v56, %v965_v57 }
  0x40   :  { %734 = vmatpush.bf16.msrb.mxu3 %v1237_v59  ;;  %v1201_v59 = vld [vmem:[%s1757_s0 + $0xe0] sm:$0xf0] }
  0x41   :  { %637 = vmatmul.bf16.vlgmr.msrb.gmra.mxu1 %v868_v4  ;;  %686 = vmatmul.bf16.vlgmr.msrb.gmra.mxu2 %v872_v5  ;;  %v972_v1 = vor.u32 %v1201_v59, %v971_v58  ;;  %v1203_v4 = vld [vmem:[%s1757_s0 + $0xf4] sm:$0xf]  ;;  %v985_v5 = vld [vmem:[%s1757_s0 + $0x104] sm:$0xf0] }
  0x42   :  { %v988_v12 = vor.u32 %v1203_v4, %v985_v5 }
  0x43   :  { %735 = vmatmul.bf16.vlgmr.msrb.gmra.mxu3 %v876_v6  ;;  %1165 = vmatmul.msk.bf16.vlgmr.msrb.gmra.mxu0 %vm555_vm0, %v880_v7  ;;  %v991_v6 = vld [vmem:[%s1757_s0 + $0xf8] sm:$0xf]  ;;  %v1206_v7 = vld [vmem:[%s1757_s0 + $0x108] sm:$0xf0] }
  0x44   :  { %v992_v13 = vor.u32 %v1206_v7, %v991_v6 }
  0x51   :  { %642 = vmatmul.bf16.gmra.mxu1 %v888_v16  ;;  %691 = vmatmul.bf16.gmra.mxu2 %v892_v17  ;;  %v1000_v16 = vor.u32 %v1207_v11, %v999_v10 }
  0x53   :  { %740 = vmatmul.bf16.gmra.mxu3 %v896_v18  ;;  %1166 = vmatmul.msk.bf16.gmra.mxu0 %vm555_vm0, %v900_v19  ;;  %v1630_v18 = vld [vmem:[%s1756_s2] ss:$0 sm:$0xff] }
  0x61   :  { %647 = vmatmul.bf16.gmra.mxu1 %v908_v28  ;;  %696 = vmatmul.bf16.gmra.mxu2 %v912_v29  ;;  %v1211_v28 = vld [vmem:[%s1757_s0 + $0x130] sm:$0xf0]  ;;  %v1209_v29 = vld [vmem:[%s1757_s0 + $0x124] sm:$0xf] }
  0x62   :  { %v1012_v37 = vor.u32 %v1211_v28, %v1011_v27 }
  0x63   :  { %745 = vmatmul.bf16.gmra.mxu3 %v916_v30  ;;  %1167 = vmatmul.msk.bf16.gmra.mxu0 %vm555_vm0, %v920_v31  ;;  %v1013_v30 = vld [vmem:[%s1757_s0 + $0x134] sm:$0xf0]  ;;  %v1019_v31 = vld [vmem:[%s1757_s0 + $0x128] sm:$0xf] }
  0x71   :  { %652 = vmatmul.bf16.gmra.mxu1 %v928_v40  ;;  %701 = vmatmul.bf16.gmra.mxu2 %v932_v41  ;;  %v1016_v40 = vor.u32 %v1209_v29, %v1013_v30  ;;  %v1020_v41 = vor.u32 %v1212_v32, %v1019_v31 }
  0x73   :  { %750 = vmatmul.bf16.gmra.mxu3 %v936_v42  ;;  %1168 = vmatmul.msk.bf16.gmra.mxu0 %vm555_vm0, %v940_v43 }
  0x81   :  { %657 = vmatmul.bf16.gmra.mxu1 %v948_v52  ;;  %706 = vmatmul.bf16.gmra.mxu2 %v952_v53 }
  0x83   :  { %755 = vmatmul.bf16.gmra.mxu3 %v956_v54  ;;  %1169 = vmatmul.msk.bf16.gmra.mxu0 %vm555_vm0, %v960_v55 }
  0x91   :  { %662 = vmatmul.bf16.gmra.mxu1 %v968_v0  ;;  %711 = vmatmul.bf16.gmra.mxu2 %v972_v1 }
  0x93   :  { %760 = vmatmul.bf16.gmra.mxu3 %v976_v2  ;;  %1170 = vmatmul.msk.bf16.gmra.mxu0 %vm555_vm0, %v980_v3 }
  0x9e   :  { %v1624_v14 = vpop.f32.mrf.mxu1 }
  0xa0   :  { %v589_v17 = vpop.f32.mrf.mxu0 }
  0xa1   :  { %667 = vmatmul.bf16.gmra.mxu1 %v988_v12  ;;  %716 = vmatmul.bf16.gmra.mxu2 %v992_v13  ;;  %v590_v55 = vadd.f32 %v1630_v18, %v589_v17 }
  0xa3   :  { %765 = vmatmul.bf16.gmra.mxu3 %v996_v15  ;;  %1171 = vmatmul.msk.bf16.gmra.mxu0 %vm555_vm0, %v1000_v16 }
  0xa4   :  { %v609_v19 = vpop.f32.mrf.mxu2 }
  0xa5   :  { %v1633_v20 = vadd.f32 %v1630_v18, %v609_v19 }
  0xa6   :  { %v619_v21 = vpop.f32.mrf.mxu3  ;;  %v1638_v23 = vpop.f32.mrf.mxu1 }
  0xa7   :  { %v1636_v22 = vadd.f32 %v1630_v18, %v619_v21 }
  0xa8   :  { %v591_v24 = vpop.f32.mrf.mxu0 }
  0xa9   :  { %v592_v63 = vadd.f32 %v1630_v18, %v591_v24 }
  0xac   :  { %v611_v33 = vpop.f32.mrf.mxu2 }
  0xad   :  { %v1665_v34 = vadd.f32 %v1630_v18, %v611_v33 }
  0xae   :  { %v621_v35 = vpop.f32.mrf.mxu3  ;;  %v1670_v39 = vpop.f32.mrf.mxu1 }
  0xaf   :  { %v1668_v38 = vadd.f32 %v1630_v18, %v621_v35  ;;  %v600_v35 = vadd.f32 %v1630_v18, %v1624_v14 }
  0xb0   :  { %v594_v42 = vpop.f32.mrf.mxu0 }
  0xb1   :  { %672 = vmatmul.bf16.gmra.mxu1 %v1008_v36  ;;  %721 = vmatmul.bf16.gmra.mxu2 %v1012_v37  ;;  %v595_v9 = vadd.f32 %v1630_v18, %v594_v42 }
  0xb3   :  { %770 = vmatmul.bf16.gmra.mxu3 %v1016_v40  ;;  %1172 = vmatmul.msk.bf16.gmra.mxu0 %vm555_vm0, %v1020_v41 }
  0xb4   :  { %v614_v43 = vpop.f32.mrf.mxu2 }
  0xb5   :  { %v1674_v44 = vadd.f32 %v1630_v18, %v614_v43 }
  0xb6   :  { %v624_v45 = vpop.f32.mrf.mxu3  ;;  %v1679_v47 = vpop.f32.mrf.mxu1 }
  0xb7   :  { %v1677_v46 = vadd.f32 %v1630_v18, %v624_v45 }
  0xb8   :  { %v596_v48 = vpop.f32.mrf.mxu0 }
  0xb9   :  { %v597_v24 = vadd.f32 %v1630_v18, %v596_v48 }
  0xbc   :  { %v616_v49 = vpop.f32.mrf.mxu2 }
  0xbd   :  { %v1682_v50 = vadd.f32 %v1630_v18, %v616_v49 }
  0xbe   :  { %v626_v51 = vpop.f32.mrf.mxu3  ;;  %v638_v53 = vpop.f32.mrf.mxu1 }
  0xbf   :  { %v1685_v52 = vadd.f32 %v1630_v18, %v626_v51  ;;  %v639_v56 = vadd.f32 %v638_v53, %v590_v55  ;;  %v602_v51 = vadd.f32 %v1630_v18, %v1638_v23 }
  0xc0   :  { %v785_v54 = vpop.f32.mrf.mxu0 }
  0xc4   :  { %v687_v57 = vpop.f32.mrf.mxu2 }
  0xc5   :  { %v688_v58 = vadd.f32 %v687_v57, %v639_v56 }
  0xc6   :  { %v736_v59 = vpop.f32.mrf.mxu3  ;;  %v640_v60 = vpop.f32.mrf.mxu1 }
  0xc7   :  { %v737_v61 = vadd.f32 %v736_v59, %v688_v58  ;;  %v641_v2 = vadd.f32 %v640_v60, %v592_v63 }
  0xc8   :  { %v787_v62 = vpop.f32.mrf.mxu0 }
  0xc9   :  { %v786_v0 = vadd.f32 %v785_v54, %v737_v61  ;;  %v605_v61 = vadd.f32 %v1630_v18, %v1670_v39 }
  0xcb   :  { %v825_v1 = vmax.f32 %v786_v0, 0.0 }
  0xcc   :  { %v689_v3 = vpop.f32.mrf.mxu2 }
  0xcd   :  { %841 = vst [vmem:[%s1758_s3] sm:$0xff] %v825_v1  ;;  %v690_v4 = vadd.f32 %v689_v3, %v641_v2 }
  0xce   :  { %v738_v5 = vpop.f32.mrf.mxu3  ;;  %v643_v6 = vpop.f32.mrf.mxu1 }
  0xcf   :  { %v739_v7 = vadd.f32 %v738_v5, %v690_v4  ;;  %v644_v12 = vadd.f32 %v643_v6, %v595_v9  ;;  %v607_v6 = vadd.f32 %v1630_v18, %v1679_v47 }
  0xd0   :  { %v790_v8 = vpop.f32.mrf.mxu0 }
  0xd1   :  { %v788_v10 = vadd.f32 %v787_v62, %v739_v7 }
  0xd3   :  { %v826_v11 = vmax.f32 %v788_v10, 0.0 }
  0xd4   :  { %v692_v13 = vpop.f32.mrf.mxu2 }
  0xd5   :  { %842 = vst [vmem:[%s1758_s3 + $0x8] sm:$0xff] %v826_v11  ;;  %v693_v15 = vadd.f32 %v692_v13, %v644_v12 }
  0xd6   :  { %v741_v16 = vpop.f32.mrf.mxu3  ;;  %v645_v17 = vpop.f32.mrf.mxu1 }
  0xd7   :  { %v742_v19 = vadd.f32 %v741_v16, %v693_v15  ;;  %v646_v27 = vadd.f32 %v645_v17, %v597_v24 }
  0xd8   :  { %v792_v21 = vpop.f32.mrf.mxu0 }
  0xd9   :  { %v791_v25 = vadd.f32 %v790_v8, %v742_v19 }
  0xdb   :  { %v827_v26 = vmax.f32 %v791_v25, 0.0 }
  0xdc   :  { %v694_v28 = vpop.f32.mrf.mxu2 }
  0xdd   :  { %843 = vst [vmem:[%s1758_s3 + $0x10] sm:$0xff] %v827_v26  ;;  %v695_v29 = vadd.f32 %v694_v28, %v646_v27 }
  0xde   :  { %v743_v30 = vpop.f32.mrf.mxu3  ;;  %v648_v31 = vpop.f32.mrf.mxu1 }
  0xdf   :  { %v744_v32 = vadd.f32 %v743_v30, %v695_v29  ;;  %v649_v40 = vadd.f32 %v648_v31, %v600_v35 }
  0xe0   :  { %v795_v33 = vpop.f32.mrf.mxu0 }
  0xe1   :  { %v793_v36 = vadd.f32 %v792_v21, %v744_v32 }
  0xe3   :  { %v828_v37 = vmax.f32 %v793_v36, 0.0 }
  0xe4   :  { %v697_v41 = vpop.f32.mrf.mxu2 }
  0xe5   :  { %844 = vst [vmem:[%s1758_s3 + $0x18] sm:$0xff] %v828_v37  ;;  %v698_v42 = vadd.f32 %v697_v41, %v649_v40 }
  0xe6   :  { %v746_v43 = vpop.f32.mrf.mxu3  ;;  %v650_v45 = vpop.f32.mrf.mxu1 }
  0xe7   :  { %v747_v48 = vadd.f32 %v746_v43, %v698_v42  ;;  %v651_v55 = vadd.f32 %v650_v45, %v602_v51 }
  0xe8   :  { %v797_v49 = vpop.f32.mrf.mxu0 }
  0xe9   :  { %v796_v53 = vadd.f32 %v795_v33, %v747_v48 }
  0xeb   :  { %v829_v54 = vmax.f32 %v796_v53, 0.0 }
  0xec   :  { %v699_v14 = vpop.f32.mrf.mxu2 }
  0xed   :  { %845 = vst [vmem:[%s1758_s3 + $0x20] sm:$0xff] %v829_v54  ;;  %v700_v56 = vadd.f32 %v699_v14, %v651_v55 }
  0xee   :  { %v748_v57 = vpop.f32.mrf.mxu3  ;;  %v653_v58 = vpop.f32.mrf.mxu1 }
  0xef   :  { %v749_v59 = vadd.f32 %v748_v57, %v700_v56  ;;  %v654_v0 = vadd.f32 %v653_v58, %v605_v61 }
  0xf0   :  { %v800_v60 = vpop.f32.mrf.mxu0 }
  0xf1   :  { %v798_v62 = vadd.f32 %v797_v49, %v749_v59 }
  0xf3   :  { %v830_v63 = vmax.f32 %v798_v62, 0.0 }
  0xf4   :  { %v702_v23 = vpop.f32.mrf.mxu2 }
  0xf5   :  { %846 = vst [vmem:[%s1758_s3 + $0x28] sm:$0xff] %v830_v63  ;;  %v703_v1 = vadd.f32 %v702_v23, %v654_v0 }
  0xf6   :  { %v751_v2 = vpop.f32.mrf.mxu3  ;;  %v655_v3 = vpop.f32.mrf.mxu1 }
  0xf7   :  { %v752_v4 = vadd.f32 %v751_v2, %v703_v1  ;;  %v656_v9 = vadd.f32 %v655_v3, %v607_v6 }
  0xf8   :  { %v802_v5 = vpop.f32.mrf.mxu0 }
  0xf9   :  { %v801_v7 = vadd.f32 %v800_v60, %v752_v4 }
  0xfb   :  { %v831_v8 = vmax.f32 %v801_v7, 0.0 }
  0xfc   :  { %v704_v39 = vpop.f32.mrf.mxu2 }
  0xfd   :  { %847 = vst [vmem:[%s1758_s3 + $0x30] sm:$0xff] %v831_v8  ;;  %v705_v10 = vadd.f32 %v704_v39, %v656_v9 }
  0xfe   :  { %v753_v11 = vpop.f32.mrf.mxu3  ;;  %v658_v12 = vpop.f32.mrf.mxu1 }
  0xff   :  { %v754_v13 = vadd.f32 %v753_v11, %v705_v10  ;;  %v659_v19 = vadd.f32 %v658_v12, %v1633_v20 }
 0x100   :  { %v805_v15 = vpop.f32.mrf.mxu0 }
 0x101   :  { %v803_v16 = vadd.f32 %v802_v5, %v754_v13 }
 0x103   :  { %v832_v17 = vmax.f32 %v803_v16, 0.0 }
 0x104   :  { %v707_v21 = vpop.f32.mrf.mxu2 }
 0x105   :  { %848 = vst [vmem:[%s1758_s3 + $0x38] sm:$0xff] %v832_v17  ;;  %v708_v18 = vadd.f32 %v707_v21, %v659_v19 }
 0x106   :  { %v756_v47 = vpop.f32.mrf.mxu3  ;;  %v660_v24 = vpop.f32.mrf.mxu1 }
 0x107   :  { %v757_v25 = vadd.f32 %v756_v47, %v708_v18  ;;  %v661_v29 = vadd.f32 %v660_v24, %v1665_v34 }
 0x108   :  { %v807_v26 = vpop.f32.mrf.mxu0 }
 0x109   :  { %v806_v27 = vadd.f32 %v805_v15, %v757_v25 }
 0x10b   :  { %v833_v28 = vmax.f32 %v806_v27, 0.0 }
 0x10c   :  { %v709_v30 = vpop.f32.mrf.mxu2 }
 0x10d   :  { %849 = vst [vmem:[%s1758_s3 + $0x40] sm:$0xff] %v833_v28  ;;  %v710_v20 = vadd.f32 %v709_v30, %v661_v29 }
 0x10e   :  { %v758_v31 = vpop.f32.mrf.mxu3  ;;  %v663_v32 = vpop.f32.mrf.mxu1 }
 0x10f   :  { %v759_v33 = vadd.f32 %v758_v31, %v710_v20  ;;  %v664_v40 = vadd.f32 %v663_v32, %v1674_v44 }
 0x110   :  { %v810_v35 = vpop.f32.mrf.mxu0 }
 0x111   :  { %v808_v36 = vadd.f32 %v807_v26, %v759_v33 }
 0x113   :  { %v834_v37 = vmax.f32 %v808_v36, 0.0 }
 0x114   :  { %v712_v41 = vpop.f32.mrf.mxu2 }
 0x115   :  { %850 = vst [vmem:[%s1758_s3 + $0x48] sm:$0xff] %v834_v37  ;;  %v713_v34 = vadd.f32 %v712_v41, %v664_v40 }
 0x116   :  { %v761_v42 = vpop.f32.mrf.mxu3  ;;  %v665_v43 = vpop.f32.mrf.mxu1 }
 0x117   :  { %v762_v45 = vadd.f32 %v761_v42, %v713_v34  ;;  %v666_v53 = vadd.f32 %v665_v43, %v1682_v50 }
 0x118   :  { %v812_v48 = vpop.f32.mrf.mxu0 }
 0x119   :  { %v811_v49 = vadd.f32 %v810_v35, %v762_v45 }
 0x11b   :  { %v835_v51 = vmax.f32 %v811_v49, 0.0 }
 0x11c   :  { %v714_v54 = vpop.f32.mrf.mxu2 }
 0x11d   :  { %851 = vst [vmem:[%s1758_s3 + $0x50] sm:$0xff] %v835_v51  ;;  %v715_v44 = vadd.f32 %v714_v54, %v666_v53 }
 0x11e   :  { %v763_v55 = vpop.f32.mrf.mxu3  ;;  %v668_v14 = vpop.f32.mrf.mxu1 }
 0x11f   :  { %v764_v56 = vadd.f32 %v763_v55, %v715_v44  ;;  %v669_v60 = vadd.f32 %v668_v14, %v1636_v22 }
 0x120   :  { %v815_v58 = vpop.f32.mrf.mxu0 }
 0x121   :  { %v813_v57 = vadd.f32 %v812_v48, %v764_v56 }
 0x123   :  { %v836_v59 = vmax.f32 %v813_v57, 0.0 }
 0x124   :  { %v717_v61 = vpop.f32.mrf.mxu2 }
 0x125   :  { %852 = vst [vmem:[%s1758_s3 + $0x58] sm:$0xff] %v836_v59  ;;  %v718_v50 = vadd.f32 %v717_v61, %v669_v60 }
 0x126   :  { %v766_v62 = vpop.f32.mrf.mxu3  ;;  %v670_v63 = vpop.f32.mrf.mxu1 }
 0x127   :  { %v767_v0 = vadd.f32 %v766_v62, %v718_v50  ;;  %v671_v2 = vadd.f32 %v670_v63, %v1668_v38 }
 0x128   :  { %v817_v3 = vpop.f32.mrf.mxu0 }
 0x129   :  { %v816_v23 = vadd.f32 %v815_v58, %v767_v0 }
 0x12b   :  { %v837_v1 = vmax.f32 %v816_v23, 0.0 }
 0x12c   :  { %v719_v4 = vpop.f32.mrf.mxu2 }
 0x12d   :  { %853 = vst [vmem:[%s1758_s3 + $0x60] sm:$0xff] %v837_v1  ;;  %v720_v22 = vadd.f32 %v719_v4, %v671_v2 }
 0x12e   :  { %v768_v5 = vpop.f32.mrf.mxu3  ;;  %v673_v6 = vpop.f32.mrf.mxu1 }
 0x12f   :  { %v769_v7 = vadd.f32 %v768_v5, %v720_v22  ;;  %v674_v39 = vadd.f32 %v673_v6, %v1677_v46 }
 0x130   :  { %v820_v12 = vpop.f32.mrf.mxu0 }
 0x131   :  { %v818_v8 = vadd.f32 %v817_v3, %v769_v7 }
 0x133   :  { %v838_v9 = vmax.f32 %v818_v8, 0.0 }
 0x134   :  { %v722_v10 = vpop.f32.mrf.mxu2 }
 0x135   :  { %854 = vst [vmem:[%s1758_s3 + $0x68] sm:$0xff] %v838_v9  ;;  %v723_v38 = vadd.f32 %v722_v10, %v674_v39 }
 0x136   :  { %v771_v11 = vpop.f32.mrf.mxu3  ;;  %v675_v15 = vpop.f32.mrf.mxu1 }
 0x137   :  { %v772_v13 = vadd.f32 %v771_v11, %v723_v38  ;;  %v676_v19 = vadd.f32 %v675_v15, %v1685_v52 }
 0x138   :  { %v822_v24 = vpop.f32.mrf.mxu0 }
 0x139   :  { %v821_v16 = vadd.f32 %v820_v12, %v772_v13 }
 0x13b   :  { %v839_v17 = vmax.f32 %v821_v16, 0.0 }
 0x13c   :  { %v724_v21 = vpop.f32.mrf.mxu2 }
 0x13d   :  { %855 = vst [vmem:[%s1758_s3 + $0x70] sm:$0xff] %v839_v17  ;;  %v725_v46 = vadd.f32 %v724_v21, %v676_v19 }
 0x13e   :  { %v773_v18 = vpop.f32.mrf.mxu3 }
 0x13f   :  { %v774_v47 = vadd.f32 %v773_v18, %v725_v46 }
 0x141   :  { %v823_v25 = vadd.f32 %v822_v24, %v774_v47 }
 0x143   :  { %v840_v26 = vmax.f32 %v823_v25, 0.0 }
 0x145   :  { %856 = vst [vmem:[%s1758_s3 + $0x78] sm:$0xff] %v840_v26 }

</bundles_post_ra>
